<compile_context>
chip_gen: v5e
topology: v5e:2x2
jax: 0.10.0
libtpu: 0.0.40
codegen_flags: <defaults>
</compile_context>

<pallas_src>
import jax
import jax.numpy as jnp
from jax import lax
from jax.experimental import pallas as pl
from jax.experimental.pallas import tpu as pltpu

_PAD = 128  # lane-dense width of the fused projection (needs H*H + H + 1 <= _PAD)


def _ttp_kernel(x_ref, wcat_ref, bcat_ref, wexp_ref, mask_ref, out_ref):
    """GB graphs per grid step; all MXU inputs bf16 with f32 accumulation."""
    for gi in range(x_ref.shape[0]):       # static, small unrolled graph loop
        x = x_ref[gi]                                           # (N, D) bf16

        # Fused proj_g1 | proj_g2 | const-1 lane.  BatchNorm (eval) and the
        # linear biases are folded into wcat/bcat; dropout = identity in eval.
        p = jnp.maximum(
            jnp.dot(x, wcat_ref[...], preferred_element_type=jnp.float32)
            + bcat_ref[...], 0.0)                               # (N, 128) f32
        p16 = p.astype(jnp.bfloat16)

        # r[k, m] = sum_j wexp_pp[k, j] * P[m, j]
        #   rows k = a*H+b      -> w_g[a] * p2[m, b]
        #   row  k = ones_col   -> b_g      (proj_g bias folded into the MXU)
        r = lax.dot_general(
            wexp_ref[...], p16,
            dimension_numbers=(((1,), (1,)), ((), ())),
            preferred_element_type=jnp.float32)                 # (128, N)

        # mm[n,m] = sum_a w_g[a] * sum_b p1[n,a,b] * p2[m,b] + b_g
        # K = 128 lane-dense contraction (no K=8 / lane-8 intermediate).
        mm = jnp.dot(p16, r.astype(jnp.bfloat16),
                     preferred_element_type=jnp.float32)        # (N, N)

        # Zero the diagonal with the precomputed off-diagonal mask (no iotas,
        # no compare/select): matches mm -= diag_embed(diag(mm)) exactly.
        mm = mm * mask_ref[...]

        # matrix = softmax(mm, 0) * softmax(mm, 1) with a SINGLE N^2 exp pass:
        #   e0      = exp(mm - max0)            column softmax numerator
        #   g[m]    = exp(max0[m] - max(mm))    length-N, <= 1
        #   e0 * g  = exp(mm - max(mm))         row softmax numerator
        # Safe while no row of mm sits ~88 below the global max; every row and
        # column contains a zeroed-diagonal 0, and max(mm) is O(1) here.
        max0 = jnp.max(mm, axis=0, keepdims=True)               # (1, N)
        e0 = jnp.exp(mm - max0)                                 # N^2 exps (EUP)
        g = jnp.exp(max0 - jnp.max(max0))                       # (1, N)
        e0g = e0 * g                                            # mm dead here
        inv0 = pl.reciprocal(jnp.sum(e0, axis=0, keepdims=True), approx=True)
        inv1 = pl.reciprocal(jnp.sum(e0g, axis=1, keepdims=True), approx=True)
        out_ref[gi] = ((e0 * inv0) * (e0g * inv1)).astype(out_ref.dtype)


def init_params(key, in_dim, hidden_dim):
    """Deterministic parameter init mirroring the PyTorch module's shapes."""
    H, H2 = hidden_dim, hidden_dim * hidden_dim
    ks = jax.random.split(key, 10)

    def linear(kw, kb, fan_in, fan_out):
        bound = 1.0 / (fan_in ** 0.5)
        w = jax.random.uniform(kw, (fan_in, fan_out), jnp.float32, -bound, bound)
        b = jax.random.uniform(kb, (fan_out,), jnp.float32, -bound, bound)
        return w, b

    w1, b1 = linear(ks[0], ks[1], in_dim, H2)        # proj_g1
    w2, b2 = linear(ks[2], ks[3], in_dim, H)         # proj_g2
    wg, bg = linear(ks[4], ks[5], H, 1)              # proj_g

    # BatchNorm1d (eval mode): gamma=1, beta=0, nontrivial running stats.
    eps = 1e-5
    rm1 = 0.1 * jax.random.normal(ks[6], (H2,), jnp.float32)
    rv1 = jnp.abs(jax.random.normal(ks[7], (H2,), jnp.float32)) + 0.5
    rm2 = 0.1 * jax.random.normal(ks[8], (H,), jnp.float32)
    rv2 = jnp.abs(jax.random.normal(ks[9], (H,), jnp.float32)) + 0.5
    s1 = 1.0 / jnp.sqrt(rv1 + eps)                   # gamma / sqrt(var+eps)
    t1 = -rm1 * s1                                   # beta - mean*scale
    s2 = 1.0 / jnp.sqrt(rv2 + eps)
    t2 = -rm2 * s2

    return dict(w1=w1, b1=b1, s1=s1, t1=t1,
                w2=w2, b2=b2, s2=s2, t2=t2,
                wg=wg, bg=bg, hidden_dim=H)


def fold_params(params):
    """One-time prep: fold BN + biases, fuse W1|W2|const-1, expand proj_g."""
    H = params["hidden_dim"]
    H2 = H * H
    D = params["w1"].shape[0]
    ones_col = H2 + H                     # lane of P that is constantly 1
    assert ones_col < _PAD, "hidden_dim too large for the fused 128-lane path"
    # TODO(synk): for H*H + H + 1 > 128, widen _PAD to the next multiple of 128
    # (everything below is width-generic).

    s1, t1, s2, t2 = params["s1"], params["t1"], params["s2"], params["t2"]
    w1f = params["w1"] * s1[None, :]
    b1f = params["b1"] * s1 + t1
    w2f = params["w2"] * s2[None, :]
    b2f = params["b2"] * s2 + t2

    # Fused projection  P = relu(x @ wcat + bcat):
    #   P[:, :H2] = p1,  P[:, H2:H2+H] = p2,  P[:, ones_col] = 1,  rest = 0.
    wcat = jnp.zeros((D, _PAD), jnp.float32)
    wcat = wcat.at[:, :H2].set(w1f).at[:, H2:H2 + H].set(w2f)
    bcat = jnp.zeros((1, _PAD), jnp.float32)
    bcat = bcat.at[0, :H2].set(b1f).at[0, H2:H2 + H].set(b2f)
    bcat = bcat.at[0, ones_col].set(1.0)

    # proj_g expanded so the whole contraction is two lane-dense matmuls:
    #   wexp_pp[a*H+b, H2+b]        = w_g[a]   (picks the p2 lanes of P)
    #   wexp_pp[ones_col, ones_col] = b_g      (picked up by the const-1 lane)
    wexp = jnp.kron(params["wg"].reshape(H, 1), jnp.eye(H, dtype=jnp.float32))
    wexp_pp = jnp.zeros((_PAD, _PAD), jnp.float32)
    wexp_pp = wexp_pp.at[:H2, H2:H2 + H].set(wexp)
    wexp_pp = wexp_pp.at[ones_col, ones_col].set(params["bg"][0])

    return dict(wcat=wcat.astype(jnp.bfloat16),
                bcat=bcat,
                wexp_pp=wexp_pp.astype(jnp.bfloat16))


def ttp_forward(x, fp, graphs_per_step=2):
    """x: (G, N, in_dim) node features, one row-block per (uniform-size) graph."""
    G, N, D = x.shape
    pad = fp["wcat"].shape[1]

    # Block a few graphs per grid step (amortizes ~0.35us/step on v5e/v6e)
    # while keeping >= 2 grid steps so both v7x TensorCores get work.
    gb = max(1, min(graphs_per_step, G))
    while G % gb:
        gb -= 1
    grid = (G // gb,)

    x_bf16 = x.astype(jnp.bfloat16)                 # halves activation DMA bytes
    offdiag = 1.0 - jnp.eye(N, dtype=jnp.float32)   # DMA'd once (constant map)

    cost = pl.CostEstimate(
        flops=G * (2 * N * D * pad + 2 * pad * pad * N + 2 * N * pad * N),
        transcendentals=G * (N * N + 2 * N),
        bytes_accessed=(G * N * D * 2 + G * N * N * 2 + D * pad * 2
                        + pad * 4 + pad * pad * 2 + N * N * 4),
    )

    return pl.pallas_call(
        _ttp_kernel,
        grid=grid,
        in_specs=[
            pl.BlockSpec((gb, N, D), lambda g: (g, 0, 0)),     # x (gb graphs)
            pl.BlockSpec((D, pad), lambda g: (0, 0)),          # fused W1|W2|1
            pl.BlockSpec((1, pad), lambda g: (0, 0)),          # fused biases
            pl.BlockSpec((pad, pad), lambda g: (0, 0)),        # expanded proj_g
            pl.BlockSpec((N, N), lambda g: (0, 0)),            # off-diag mask
        ],
        out_specs=pl.BlockSpec((gb, N, N), lambda g: (g, 0, 0)),
        out_shape=jax.ShapeDtypeStruct((G, N, N), jnp.bfloat16),
        compiler_params=pltpu.CompilerParams(
            dimension_semantics=("parallel",)),     # shard steps on v7x cores
        cost_estimate=cost,
    )(x_bf16, fp["wcat"], fp["bcat"], fp["wexp_pp"], offdiag)


def ttp_reference(x, params, edge_thresh):
    """Pure-JAX f32 reference that mirrors the PyTorch op order exactly."""
    H = params["hidden_dim"]

    def one(xg):
        N = xg.shape[0]
        p1 = jnp.maximum((xg @ params["w1"] + params["b1"]) * params["s1"]
                         + params["t1"], 0.0)
        p2 = jnp.maximum((xg @ params["w2"] + params["b2"]) * params["s2"]
                         + params["t2"], 0.0)
        h_proj1 = p1.reshape(N * H, H)
        h_proj2 = p2.T
        mm = (h_proj1 @ h_proj2).reshape(N, H, N).transpose(0, 2, 1)
        mm = (mm @ params["wg"] + params["bg"]).squeeze(-1)
        mm = mm - jnp.diag(jnp.diag(mm))
        return jax.nn.softmax(mm, axis=0) * jax.nn.softmax(mm, axis=1)

    matrix = jax.vmap(one)(x)
    return matrix, matrix > edge_thresh


if __name__ == "__main__":
    # One batched dgl graph = G sub-graphs of N nodes each (uniform N).
    G, N, in_dim, hidden_dim = 4, 128, 16, 8
    edge_thresh = 0.01

    key = jax.random.PRNGKey(0)
    k_param, k_x = jax.random.split(key)
    params = init_params(k_param, in_dim, hidden_dim)
    x = jax.random.normal(k_x, (G, N, in_dim), jnp.float32)   # g.ndata['feat']

    folded = fold_params(params)                              # one-time prep

    @jax.jit
    def run(x, fp):
        matrix = ttp_forward(x, fp)
        # Threshold OUTSIDE the kernel: fuses with jnp.nonzero, and changing
        # edge_thresh never recompiles the Pallas kernel.
        return matrix, matrix > edge_thresh

    matrix, edge_mask = run(x, folded)
    jax.block_until_ready((matrix, edge_mask))

    ref_matrix, ref_mask = ttp_reference(x, params, edge_thresh)
    # bf16 MXU inputs/output + approx reciprocals => loosened tolerance.
    assert jnp.allclose(matrix.astype(jnp.float32), ref_matrix,
                        rtol=0.15, atol=1e-5), "matrix mismatch"
    # Edge mask: ignore entries numerically at the threshold (bf16 rounding
    # can flip a compare that sits within ~5e-3 of edge_thresh).
    decided = jnp.abs(ref_matrix - edge_thresh) > 5e-3
    assert bool(jnp.all(jnp.where(decided, edge_mask == ref_mask, True))), \
        "edge mask mismatch"

    # Glue equivalent of torch.where(matrix > thresh) -> g.add_edges(...)
    src, dst = jnp.nonzero(edge_mask[0])
    _ = (src, dst)

    print("KERNEL_OK")
</pallas_src>

<mosaic_0001>
module attributes {stable_mosaic.version = 11 : i64} {
  func.func @_ttp_kernel(%arg0: i32, %arg1: memref<2x128x16xbf16, #tpu.memory_space<vmem>>, %arg2: memref<16x128xbf16, #tpu.memory_space<vmem>>, %arg3: memref<1x128xf32, #tpu.memory_space<vmem>>, %arg4: memref<128x128xbf16, #tpu.memory_space<vmem>>, %arg5: memref<128x128xf32, #tpu.memory_space<vmem>>, %arg6: memref<2x128x128xbf16, #tpu.memory_space<vmem>>) attributes {dimension_semantics = [#tpu.dimension_semantics<parallel>], iteration_bounds = array<i64: 2>, scalar_prefetch = 0 : i64, scratch_operands = 0 : i64, tpu.core_type = #tpu.core_type<tc>, window_params = [{transform_indices = @transform_0, window_bounds = array<i64: 2, 128, 16>}, {pipeline_mode = #tpu.pipeline_mode<synchronous>, transform_indices = @transform_1, window_bounds = array<i64: 16, 128>}, {pipeline_mode = #tpu.pipeline_mode<synchronous>, transform_indices = @transform_2, window_bounds = array<i64: 1, 128>}, {pipeline_mode = #tpu.pipeline_mode<synchronous>, transform_indices = @transform_3, window_bounds = array<i64: 128, 128>}, {pipeline_mode = #tpu.pipeline_mode<synchronous>, transform_indices = @transform_4, window_bounds = array<i64: 128, 128>}, {transform_indices = @transform_5, window_bounds = array<i64: 2, 128, 128>}]} {
    %c0 = arith.constant 0 : index
    %c0_0 = arith.constant 0 : index
    %c0_1 = arith.constant 0 : index
    %0 = vector.load %arg1[%c0, %c0_0, %c0_1] : memref<2x128x16xbf16, #tpu.memory_space<vmem>>, vector<1x128x16xbf16>
    %1 = vector.shape_cast %0 : vector<1x128x16xbf16> to vector<128x16xbf16>
    %c0_2 = arith.constant 0 : index
    %c0_3 = arith.constant 0 : index
    %2 = vector.load %arg2[%c0_2, %c0_3] : memref<16x128xbf16, #tpu.memory_space<vmem>>, vector<16x128xbf16>
    %cst = arith.constant dense<0.000000e+00> : vector<128x128xf32>
    %3 = tpu.matmul %1, %2, %cst {dimension_numbers = #tpu.dot_dimension_numbers<[1], [0], [0], [1], [0, 0, 1, 1], [], []>} : vector<128x16xbf16>, vector<16x128xbf16>, vector<128x128xf32> -> vector<128x128xf32>
    %c0_4 = arith.constant 0 : index
    %c0_5 = arith.constant 0 : index
    %4 = vector.load %arg3[%c0_4, %c0_5] : memref<1x128xf32, #tpu.memory_space<vmem>>, vector<1x128xf32>
    %5 = vector.broadcast %4 : vector<1x128xf32> to vector<128x128xf32>
    %6 = arith.addf %3, %5 : vector<128x128xf32>
    %cst_6 = arith.constant 0.000000e+00 : f32
    %7 = vector.broadcast %cst_6 : f32 to vector<128x128xf32>
    %8 = arith.maximumf %6, %7 : vector<128x128xf32>
    %9 = arith.truncf %8 : vector<128x128xf32> to vector<128x128xbf16>
    %c0_7 = arith.constant 0 : index
    %c0_8 = arith.constant 0 : index
    %10 = vector.load %arg4[%c0_7, %c0_8] : memref<128x128xbf16, #tpu.memory_space<vmem>>, vector<128x128xbf16>
    %cst_9 = arith.constant dense<0.000000e+00> : vector<128x128xf32>
    %11 = tpu.matmul %10, %9, %cst_9 {dimension_numbers = #tpu.dot_dimension_numbers<[1], [1], [0], [0], [0, 0, 1, 0], [], []>} : vector<128x128xbf16>, vector<128x128xbf16>, vector<128x128xf32> -> vector<128x128xf32>
    %12 = arith.truncf %11 : vector<128x128xf32> to vector<128x128xbf16>
    %cst_10 = arith.constant dense<0.000000e+00> : vector<128x128xf32>
    %13 = tpu.matmul %9, %12, %cst_10 {dimension_numbers = #tpu.dot_dimension_numbers<[1], [0], [0], [1], [0, 0, 1, 1], [], []>} : vector<128x128xbf16>, vector<128x128xbf16>, vector<128x128xf32> -> vector<128x128xf32>
    %c0_11 = arith.constant 0 : index
    %c0_12 = arith.constant 0 : index
    %14 = vector.load %arg5[%c0_11, %c0_12] : memref<128x128xf32, #tpu.memory_space<vmem>>, vector<128x128xf32>
    %15 = arith.mulf %13, %14 : vector<128x128xf32>
    %cst_13 = arith.constant dense<0xFF800000> : vector<128xf32>
    %16 = vector.multi_reduction <maximumf>, %15, %cst_13 [0] : vector<128x128xf32> to vector<128xf32>
    %17 = vector.shape_cast %16 : vector<128xf32> to vector<1x128xf32>
    %18 = vector.broadcast %17 : vector<1x128xf32> to vector<128x128xf32>
    %19 = arith.subf %15, %18 : vector<128x128xf32>
    %20 = math.exp %19 : vector<128x128xf32>
    %21 = vector.shape_cast %17 : vector<1x128xf32> to vector<1x1x128xf32>
    %cst_14 = arith.constant dense<0xFF800000> : vector<1xf32>
    %22 = vector.multi_reduction <maximumf>, %21, %cst_14 [1, 2] : vector<1x1x128xf32> to vector<1xf32>
    %23 = vector.shape_cast %22 : vector<1xf32> to vector<1x1x1xf32>
    %24 = vector.extract %23[0, 0, 0] : f32 from vector<1x1x1xf32>
    %25 = vector.broadcast %24 : f32 to vector<1x128xf32>
    %26 = arith.subf %17, %25 : vector<1x128xf32>
    %27 = math.exp %26 : vector<1x128xf32>
    %28 = vector.broadcast %27 : vector<1x128xf32> to vector<128x128xf32>
    %29 = arith.mulf %20, %28 : vector<128x128xf32>
    %cst_15 = arith.constant dense<0.000000e+00> : vector<128xf32>
    %30 = vector.multi_reduction <add>, %20, %cst_15 [0] : vector<128x128xf32> to vector<128xf32>
    %31 = vector.shape_cast %30 : vector<128xf32> to vector<1x128xf32>
    %32 = tpu.reciprocal %31 {approx = true} : vector<1x128xf32> -> vector<1x128xf32>
    %cst_16 = arith.constant dense<0.000000e+00> : vector<128xf32>
    %33 = vector.multi_reduction <add>, %29, %cst_16 [1] : vector<128x128xf32> to vector<128xf32>
    %34 = vector.shape_cast %33 : vector<128xf32> to vector<128x1xf32>
    %35 = tpu.reciprocal %34 {approx = true} : vector<128x1xf32> -> vector<128x1xf32>
    %36 = vector.broadcast %32 : vector<1x128xf32> to vector<128x128xf32>
    %37 = arith.mulf %20, %36 : vector<128x128xf32>
    %38 = vector.broadcast %35 : vector<128x1xf32> to vector<128x128xf32>
    %39 = arith.mulf %29, %38 : vector<128x128xf32>
    %40 = arith.mulf %37, %39 : vector<128x128xf32>
    %41 = arith.truncf %40 : vector<128x128xf32> to vector<128x128xbf16>
    %c0_17 = arith.constant 0 : index
    %c0_18 = arith.constant 0 : index
    %c0_19 = arith.constant 0 : index
    %42 = vector.load %arg6[%c0_17, %c0_18, %c0_19] : memref<2x128x128xbf16, #tpu.memory_space<vmem>>, vector<1x128x128xbf16>
    %43 = vector.shape_cast %42 : vector<1x128x128xbf16> to vector<128x128xbf16>
    %44 = vector.shape_cast %41 : vector<128x128xbf16> to vector<1x128x128xbf16>
    tpu.vector_store %arg6[%c0_17, %c0_18, %c0_19], %44 {strides = array<i32>} : memref<2x128x128xbf16, #tpu.memory_space<vmem>>, vector<1x128x128xbf16>,
    %c1 = arith.constant 1 : index
    %c0_20 = arith.constant 0 : index
    %c0_21 = arith.constant 0 : index
    %45 = vector.load %arg1[%c1, %c0_20, %c0_21] : memref<2x128x16xbf16, #tpu.memory_space<vmem>>, vector<1x128x16xbf16>
    %46 = vector.shape_cast %45 : vector<1x128x16xbf16> to vector<128x16xbf16>
    %c0_22 = arith.constant 0 : index
    %c0_23 = arith.constant 0 : index
    %47 = vector.load %arg2[%c0_22, %c0_23] : memref<16x128xbf16, #tpu.memory_space<vmem>>, vector<16x128xbf16>
    %cst_24 = arith.constant dense<0.000000e+00> : vector<128x128xf32>
    %48 = tpu.matmul %46, %47, %cst_24 {dimension_numbers = #tpu.dot_dimension_numbers<[1], [0], [0], [1], [0, 0, 1, 1], [], []>} : vector<128x16xbf16>, vector<16x128xbf16>, vector<128x128xf32> -> vector<128x128xf32>
    %c0_25 = arith.constant 0 : index
    %c0_26 = arith.constant 0 : index
    %49 = vector.load %arg3[%c0_25, %c0_26] : memref<1x128xf32, #tpu.memory_space<vmem>>, vector<1x128xf32>
    %50 = vector.broadcast %49 : vector<1x128xf32> to vector<128x128xf32>
    %51 = arith.addf %48, %50 : vector<128x128xf32>
    %cst_27 = arith.constant 0.000000e+00 : f32
    %52 = vector.broadcast %cst_27 : f32 to vector<128x128xf32>
    %53 = arith.maximumf %51, %52 : vector<128x128xf32>
    %54 = arith.truncf %53 : vector<128x128xf32> to vector<128x128xbf16>
    %c0_28 = arith.constant 0 : index
    %c0_29 = arith.constant 0 : index
    %55 = vector.load %arg4[%c0_28, %c0_29] : memref<128x128xbf16, #tpu.memory_space<vmem>>, vector<128x128xbf16>
    %cst_30 = arith.constant dense<0.000000e+00> : vector<128x128xf32>
    %56 = tpu.matmul %55, %54, %cst_30 {dimension_numbers = #tpu.dot_dimension_numbers<[1], [1], [0], [0], [0, 0, 1, 0], [], []>} : vector<128x128xbf16>, vector<128x128xbf16>, vector<128x128xf32> -> vector<128x128xf32>
    %57 = arith.truncf %56 : vector<128x128xf32> to vector<128x128xbf16>
    %cst_31 = arith.constant dense<0.000000e+00> : vector<128x128xf32>
    %58 = tpu.matmul %54, %57, %cst_31 {dimension_numbers = #tpu.dot_dimension_numbers<[1], [0], [0], [1], [0, 0, 1, 1], [], []>} : vector<128x128xbf16>, vector<128x128xbf16>, vector<128x128xf32> -> vector<128x128xf32>
    %c0_32 = arith.constant 0 : index
    %c0_33 = arith.constant 0 : index
    %59 = vector.load %arg5[%c0_32, %c0_33] : memref<128x128xf32, #tpu.memory_space<vmem>>, vector<128x128xf32>
    %60 = arith.mulf %58, %59 : vector<128x128xf32>
    %cst_34 = arith.constant dense<0xFF800000> : vector<128xf32>
    %61 = vector.multi_reduction <maximumf>, %60, %cst_34 [0] : vector<128x128xf32> to vector<128xf32>
    %62 = vector.shape_cast %61 : vector<128xf32> to vector<1x128xf32>
    %63 = vector.broadcast %62 : vector<1x128xf32> to vector<128x128xf32>
    %64 = arith.subf %60, %63 : vector<128x128xf32>
    %65 = math.exp %64 : vector<128x128xf32>
    %66 = vector.shape_cast %62 : vector<1x128xf32> to vector<1x1x128xf32>
    %cst_35 = arith.constant dense<0xFF800000> : vector<1xf32>
    %67 = vector.multi_reduction <maximumf>, %66, %cst_35 [1, 2] : vector<1x1x128xf32> to vector<1xf32>
    %68 = vector.shape_cast %67 : vector<1xf32> to vector<1x1x1xf32>
    %69 = vector.extract %68[0, 0, 0] : f32 from vector<1x1x1xf32>
    %70 = vector.broadcast %69 : f32 to vector<1x128xf32>
    %71 = arith.subf %62, %70 : vector<1x128xf32>
    %72 = math.exp %71 : vector<1x128xf32>
    %73 = vector.broadcast %72 : vector<1x128xf32> to vector<128x128xf32>
    %74 = arith.mulf %65, %73 : vector<128x128xf32>
    %cst_36 = arith.constant dense<0.000000e+00> : vector<128xf32>
    %75 = vector.multi_reduction <add>, %65, %cst_36 [0] : vector<128x128xf32> to vector<128xf32>
    %76 = vector.shape_cast %75 : vector<128xf32> to vector<1x128xf32>
    %77 = tpu.reciprocal %76 {approx = true} : vector<1x128xf32> -> vector<1x128xf32>
    %cst_37 = arith.constant dense<0.000000e+00> : vector<128xf32>
    %78 = vector.multi_reduction <add>, %74, %cst_37 [1] : vector<128x128xf32> to vector<128xf32>
    %79 = vector.shape_cast %78 : vector<128xf32> to vector<128x1xf32>
    %80 = tpu.reciprocal %79 {approx = true} : vector<128x1xf32> -> vector<128x1xf32>
    %81 = vector.broadcast %77 : vector<1x128xf32> to vector<128x128xf32>
    %82 = arith.mulf %65, %81 : vector<128x128xf32>
    %83 = vector.broadcast %80 : vector<128x1xf32> to vector<128x128xf32>
    %84 = arith.mulf %74, %83 : vector<128x128xf32>
    %85 = arith.mulf %82, %84 : vector<128x128xf32>
    %86 = arith.truncf %85 : vector<128x128xf32> to vector<128x128xbf16>
    %c1_38 = arith.constant 1 : index
    %c0_39 = arith.constant 0 : index
    %c0_40 = arith.constant 0 : index
    %87 = vector.load %arg6[%c1_38, %c0_39, %c0_40] : memref<2x128x128xbf16, #tpu.memory_space<vmem>>, vector<1x128x128xbf16>
    %88 = vector.shape_cast %87 : vector<1x128x128xbf16> to vector<128x128xbf16>
    %89 = vector.shape_cast %86 : vector<128x128xbf16> to vector<1x128x128xbf16>
    tpu.vector_store %arg6[%c1_38, %c0_39, %c0_40], %89 {strides = array<i32>} : memref<2x128x128xbf16, #tpu.memory_space<vmem>>, vector<1x128x128xbf16>,
    return
  }
  func.func @transform_0(%arg0: i32) -> (i32, i32, i32) {
    %c0_i32 = arith.constant 0 : i32
    %c0_i32_0 = arith.constant 0 : i32
    %c0_i32_1 = arith.constant 0 : i32
    return %arg0, %c0_i32, %c0_i32_0 : i32, i32, i32
  }
  func.func @transform_1(%arg0: i32) -> (i32, i32) {
    %c0_i32 = arith.constant 0 : i32
    %c0_i32_0 = arith.constant 0 : i32
    %c0_i32_1 = arith.constant 0 : i32
    return %c0_i32, %c0_i32_0 : i32, i32
  }
  func.func @transform_2(%arg0: i32) -> (i32, i32) {
    %c0_i32 = arith.constant 0 : i32
    %c0_i32_0 = arith.constant 0 : i32
    %c0_i32_1 = arith.constant 0 : i32
    return %c0_i32, %c0_i32_0 : i32, i32
  }
  func.func @transform_3(%arg0: i32) -> (i32, i32) {
    %c0_i32 = arith.constant 0 : i32
    %c0_i32_0 = arith.constant 0 : i32
    %c0_i32_1 = arith.constant 0 : i32
    return %c0_i32, %c0_i32_0 : i32, i32
  }
  func.func @transform_4(%arg0: i32) -> (i32, i32) {
    %c0_i32 = arith.constant 0 : i32
    %c0_i32_0 = arith.constant 0 : i32
    %c0_i32_1 = arith.constant 0 : i32
    return %c0_i32, %c0_i32_0 : i32, i32
  }
  func.func @transform_5(%arg0: i32) -> (i32, i32, i32) {
    %c0_i32 = arith.constant 0 : i32
    %c0_i32_0 = arith.constant 0 : i32
    %c0_i32_1 = arith.constant 0 : i32
    return %arg0, %c0_i32, %c0_i32_0 : i32, i32, i32
  }
}

</mosaic_0001>

<bundles_post_ra>
// kernel: run.1
= control target key start
LH: loop header
LB: loop body
LE: loop exit
PB: predicated region body
PF: predicated region fallthrough
CT: control target
= control target key end

     0   :  { %s2031_s18 = smov 0   ;;  %s2948_s0 = inlined_call_operand.vmem [shape: bf16[4,128,16], index: 0, kind: input, shape index: {}]   ;;  %s2949_s1 = inlined_call_operand.vmem [shape: bf16[16,128], index: 1, kind: input, shape index: {}]   ;;  %s2950_s2 = inlined_call_operand.vmem [shape: f32[1,128], index: 2, kind: input, shape index: {}]   ;;  %s2951_s3 = inlined_call_operand.vmem [shape: bf16[128,128], index: 3, kind: input, shape index: {}]   ;;  %s2952_s4 = inlined_call_operand.vmem [shape: f32[128,128], index: 4, kind: input, shape index: {}]   ;;  %s2953_s5 = inlined_call_operand.vmem [shape: bf16[4,128,128], index: 5, kind: output, shape index: {}]  }
   0x1 LB: > { %s1513_s19 = sadd.s32 4294967295, %s1999_s18   ;;  %p1517_p0 = scmp.ge.s32.totalorder %s1999_s18, 1  ;;  %s1999_s18 = sphi %s2031_s18, %s15_s18  }
   0x2   : > { %p189_p1 = scmp.lt.s32.totalorder %s1999_s18, 3 }
   0x4   : > { %p190_p2 = pnand %p1517_p0, %p189_p1 }
   0x6   : > { %193 = sbr.rel (%p190_p2) target bundleno = 1499 (0x5db), region = 40 }
   0xb   : > { %v1720_v0 = vld [vmem:[%s2949_s1] sm:$0xff]  ;;  %s1518_s22 = sshll.u32 %s1513_s19, 1  ;;  %vm302_vm0 = vcmask 130048  }
   0xc   : > { %p220_p3 = scmp.lt.s32.totalorder %s1518_s22, 3  ;;  %1841 = vmatpush.bf16.msra.mxu2 %v1720_v0  ;;  %334 = vmatpush.bf16.msra.mxu0 %v1720_v0  ;;  %v2071_v10 = vld [vmem:[%s2950_s2] ss:$0 sm:$0xff] }
   0xd   : > { %v1737_v26 = vld [vmem:[%s2949_s1] sm:$0xff] }
   0xe   : > { %s2984_s22 = smov (!%p220_p3, %s1518_s22), 3  ;;  %1842 = vmatpush.bf16.msra.mxu3 %v1737_v26 }
   0xf   : > { %s1710_s23 = sshll.u32 %s2984_s22, 6 }
  0x10   : > { %s2050_s26 = scalar_lea.vmem %s2948_s0, %s1710_s23  ;;  %s2668_s9 = scalar_lea.vmem %s2953_s5, %s1710_s23 }
  0x11   : > { %v1716_v1 = vld [vmem:[%s2050_s26 + $0x20] sm:$0xff]  ;;  %v1717_v3 = vld [vmem:[%s2050_s26 + $0x28] sm:$0xff]  ;;  %v1718_v5 = vld [vmem:[%s2050_s26 + $0x30] sm:$0xff] }
  0x12   : > { %v1712_v2 = vld [vmem:[%s2050_s26] sm:$0xff]  ;;  %1564 = vmatmul.msk.bf16.vlgmr.msra.gmra.mxu2 %vm302_vm0, %v1716_v1  ;;  %v1713_v4 = vld [vmem:[%s2050_s26 + $0x8] sm:$0xff]  ;;  %v1714_v6 = vld [vmem:[%s2050_s26 + $0x10] sm:$0xff] }
  0x13   : > { %1560 = vmatmul.msk.bf16.vlgmr.msra.gmra.mxu0 %vm302_vm0, %v1712_v2  ;;  %v1719_v7 = vld [vmem:[%s2050_s26 + $0x38] sm:$0xff]  ;;  %v1733_v34 = vld [vmem:[%s2050_s26 + $0x60] sm:$0xff]  ;;  %v1734_v48 = vld [vmem:[%s2050_s26 + $0x68] sm:$0xff] }
  0x14   : > { %v1715_v8 = vld [vmem:[%s2050_s26 + $0x18] sm:$0xff]  ;;  %v1735_v57 = vld [vmem:[%s2050_s26 + $0x70] sm:$0xff] }
  0x15   : > { %v1732_v29 = vld [vmem:[%s2050_s26 + $0x58] sm:$0xff] }
  0x16   : > { %1655 = vmatmul.msk.bf16.vlgmr.msra.gmra.mxu3 %vm302_vm0, %v1732_v29  ;;  %v1736_v1 = vld [vmem:[%s2050_s26 + $0x78] sm:$0xff] }
  0x22   : > { %1565 = vmatmul.msk.bf16.gmra.mxu2 %vm302_vm0, %v1717_v3 }
  0x23   : > { %1561 = vmatmul.msk.bf16.gmra.mxu0 %vm302_vm0, %v1713_v4 }
  0x26   : > { %1656 = vmatmul.msk.bf16.gmra.mxu3 %vm302_vm0, %v1733_v34 }
  0x32   : > { %1566 = vmatmul.msk.bf16.gmra.mxu2 %vm302_vm0, %v1718_v5 }
  0x33   : > { %1562 = vmatmul.msk.bf16.gmra.mxu0 %vm302_vm0, %v1714_v6 }
  0x36   : > { %1657 = vmatmul.msk.bf16.gmra.mxu3 %vm302_vm0, %v1734_v48 }
  0x42   : > { %1567 = vmatmul.msk.bf16.gmra.mxu2 %vm302_vm0, %v1719_v7 }
  0x43   : > { %1563 = vmatmul.msk.bf16.gmra.mxu0 %vm302_vm0, %v1715_v8  ;;  %v1721_v8 = vld [vmem:[%s2951_s3] sm:$0xff] }
  0x46   : > { %1658 = vmatmul.msk.bf16.gmra.mxu3 %vm302_vm0, %v1735_v57 }
  0x56   : > { %1659 = vmatmul.msk.bf16.gmra.mxu3 %vm302_vm0, %v1736_v1 }
  0x90   : > { %v336_v9 = vpop.f32.mrf.mxu0 }
  0x91   : > { %v337_v11 = vadd.f32 %v2071_v10, %v336_v9  ;;  %v1722_v9 = vld [vmem:[%s2951_s3 + $0x8] sm:$0xff] }
  0x93   : > { %v376_v14 = vmax.f32 %v337_v11, 0.0  ;;  %v1724_v11 = vld [vmem:[%s2951_s3 + $0x18] sm:$0xff] }
  0x95   : > { %v356_v12 = vpop.f32.mrf.mxu2 }
  0x96   : > { %v357_v17 = vadd.f32 %v2071_v10, %v356_v12 }
  0x98   : > { %v338_v13 = vpop.f32.mrf.mxu0  ;;  %v384_v21 = vmax.f32 %v357_v17, 0.0  ;;  %v1726_v17 = vld [vmem:[%s2951_s3 + $0x28] sm:$0xff] }
  0x99   : > { %v339_v15 = vadd.f32 %v2071_v10, %v338_v13  ;;  %v961_v12 = vpop.f32.mrf.mxu3 }
  0x9b   : > { %v377_v16 = vmax.f32 %v339_v15, 0.0 }
  0x9d   : > { %v2076_v18 = vpack.c.bf16 %v377_v16, %v376_v14  ;;  %v358_v19 = vpop.f32.mrf.mxu2  ;;  %v1725_v14 = vld [vmem:[%s2951_s3 + $0x20] sm:$0xff] }
  0x9e   : > { %v359_v20 = vadd.f32 %v2071_v10, %v358_v19 }
  0xa0   : > { %v385_v22 = vmax.f32 %v359_v20, 0.0  ;;  %v341_v28 = vpop.f32.mrf.mxu0 }
  0xa1   : > { %v342_v2 = vadd.f32 %v2071_v10, %v341_v28  ;;  %v963_v13 = vpop.f32.mrf.mxu3 }
  0xa2   : > { %v2079_v23 = vpack.c.bf16 %v385_v22, %v384_v21  ;;  %v1727_v21 = vld [vmem:[%s2951_s3 + $0x30] sm:$0xff] }
  0xa3   : > { %v378_v5 = vmax.f32 %v342_v2, 0.0  ;;  %v1731_v2 = vld [vmem:[%s2050_s26 + $0x50] sm:$0xff] }
  0xa5   : > { %v361_v24 = vpop.f32.mrf.mxu2 }
  0xa6   : > { %v362_v49 = vadd.f32 %v2071_v10, %v361_v24 }
  0xa8   : > { %v343_v31 = vpop.f32.mrf.mxu0  ;;  %v386_v52 = vmax.f32 %v362_v49, 0.0 }
  0xa9   : > { %v344_v3 = vadd.f32 %v2071_v10, %v343_v31  ;;  %v966_v15 = vpop.f32.mrf.mxu3 }
  0xab   : > { %v379_v6 = vmax.f32 %v344_v3, 0.0 }
  0xad   : > { %v363_v25 = vpop.f32.mrf.mxu2  ;;  %v2122_v7 = vpack.c.bf16 %v379_v6, %v378_v5 }
  0xae   : > { %v364_v46 = vadd.f32 %v2071_v10, %v363_v25  ;;  %v1728_v25 = vld [vmem:[%s2951_s3 + $0x38] sm:$0xff] }
  0xb0   : > { %v346_v33 = vpop.f32.mrf.mxu0  ;;  %v387_v51 = vmax.f32 %v364_v46, 0.0 }
  0xb1   : > { %v347_v60 = vadd.f32 %v2071_v10, %v346_v33  ;;  %v968_v16 = vpop.f32.mrf.mxu3 }
  0xb2   : > { %v2102_v53 = vpack.c.bf16 %v387_v51, %v386_v52 }
  0xb3   : > { %v380_v63 = vmax.f32 %v347_v60, 0.0 }
  0xb5   : > { %v366_v27 = vpop.f32.mrf.mxu2 }
  0xb6   : > { %v367_v43 = vadd.f32 %v2071_v10, %v366_v27  ;;  %v2153_v27 = vld [vmem:[%s2950_s2] ss:$0 sm:$0xff] }
  0xb7   : > { %v967_v46 = vadd.f32 %v2153_v27, %v966_v15  ;;  %v969_v48 = vadd.f32 %v2153_v27, %v968_v16 }
  0xb8   : > { %v348_v42 = vpop.f32.mrf.mxu0  ;;  %v388_v45 = vmax.f32 %v367_v43, 0.0 }
  0xb9   : > { %v349_v61 = vadd.f32 %v2071_v10, %v348_v42  ;;  %v971_v19 = vpop.f32.mrf.mxu3  ;;  %v994_v52 = vmax.f32 %v967_v46, 0.0 }
  0xbb   : > { %v381_v0 = vmax.f32 %v349_v61, 0.0 }
  0xbd   : > { %v368_v30 = vpop.f32.mrf.mxu2  ;;  %v2118_v4 = vpack.c.bf16 %v381_v0, %v380_v63 }
  0xbe   : > { %v369_v40 = vadd.f32 %v2071_v10, %v368_v30 }
  0xc0   : > { %v389_v44 = vmax.f32 %v369_v40, 0.0  ;;  %v351_v50 = vpop.f32.mrf.mxu0  ;;  %v972_v40 = vadd.f32 %v2153_v27, %v971_v19 }
  0xc1   : > { %v352_v55 = vadd.f32 %v2071_v10, %v351_v50  ;;  %v973_v20 = vpop.f32.mrf.mxu3 }
  0xc2   : > { %v2096_v47 = vpack.c.bf16 %v389_v44, %v388_v45  ;;  %v974_v42 = vadd.f32 %v2153_v27, %v973_v20  ;;  %v996_v44 = vmax.f32 %v972_v40, 0.0 }
  0xc3   : > { %v382_v58 = vmax.f32 %v352_v55, 0.0  ;;  %v1730_v55 = vld [vmem:[%s2050_s26 + $0x48] sm:$0xff] }
  0xc4   : > { %v997_v45 = vmax.f32 %v974_v42, 0.0 }
  0xc5   : > { %v371_v32 = vpop.f32.mrf.mxu2 }
  0xc6   : > { %v372_v35 = vadd.f32 %v2071_v10, %v371_v32  ;;  %v2171_v51 = vpack.c.bf16 %v997_v45, %v996_v44 }
  0xc8   : > { %v390_v38 = vmax.f32 %v372_v35, 0.0  ;;  %v353_v54 = vpop.f32.mrf.mxu0 }
  0xc9   : > { %v354_v56 = vadd.f32 %v2071_v10, %v353_v54  ;;  %v976_v22 = vpop.f32.mrf.mxu3  ;;  %v995_v54 = vmax.f32 %v969_v48, 0.0 }
  0xca   : > { %v977_v32 = vadd.f32 %v2153_v27, %v976_v22 }
  0xcb   : > { %v383_v59 = vmax.f32 %v354_v56, 0.0  ;;  %v2175_v57 = vpack.c.bf16 %v995_v54, %v994_v52  ;;  %v1744_v52 = vld [vmem:[%s2951_s3 + $0x30] sm:$0xff] }
  0xcd   : > { %v373_v36 = vpop.f32.mrf.mxu2  ;;  %v2112_v62 = vpack.c.bf16 %v383_v59, %v382_v58  ;;  %v962_v58 = vadd.f32 %v2153_v27, %v961_v12  ;;  %v964_v59 = vadd.f32 %v2153_v27, %v963_v13 }
  0xce   : > { %v374_v37 = vadd.f32 %v2071_v10, %v373_v36  ;;  %v1723_v10 = vld [vmem:[%s2951_s3 + $0x10] sm:$0xff]  ;;  %v998_v36 = vmax.f32 %v977_v32, 0.0 }
  0xcf   : > { %v992_v60 = vmax.f32 %v962_v58, 0.0  ;;  %v993_v61 = vmax.f32 %v964_v59, 0.0 }
  0xd0   : > { %v391_v39 = vmax.f32 %v374_v37, 0.0  ;;  %v1729_v37 = vld [vmem:[%s2050_s26 + $0x40] sm:$0xff] }
  0xd1   : > { %v978_v24 = vpop.f32.mrf.mxu3  ;;  %v2181_v1 = vpack.c.bf16 %v993_v61, %v992_v60 }
  0xd2   : > { %v2091_v41 = vpack.c.bf16 %v391_v39, %v390_v38  ;;  %v979_v33 = vadd.f32 %v2153_v27, %v978_v24 }
  0xd4   : > { %464 = vmatpush.bf16.xpose.msra.mxu1 %v2091_v41  ;;  %v999_v38 = vmax.f32 %v979_v33, 0.0 }
  0xd6   : > { %v2166_v43 = vpack.c.bf16 %v999_v38, %v998_v36 }
  0xdc   : > { %465 = vmatpush.bf16.xpose.msra.mxu1 %v2096_v47 }
  0xe4   : > { %466 = vmatpush.bf16.xpose.msra.mxu1 %v2102_v53 }
  0xec   : > { %467 = vmatpush.bf16.xpose.msra.mxu1 %v2079_v23 }
  0xf4   : > { %468 = vmatpush.bf16.xpose.msra.mxu1 %v2112_v62 }
  0xfc   : > { %469 = vmatpush.bf16.xpose.msra.mxu1 %v2118_v4 }
 0x104   : > { %470 = vmatpush.bf16.xpose.msra.mxu1 %v2122_v7 }
 0x10c   : > { %471 = vmatpush.bf16.xpose.msra.mxu1 %v2076_v18 }
 0x113   : > { %472 = vmatmul.bf16.vlgmr.msra.gmra.mxu1 %v1721_v8 }
 0x114   : > { %944 = vmatpush.bf16.msrb.mxu1 %v1737_v26  ;;  %v981_v26 = vpop.f32.mrf.mxu3 }
 0x115   : > { %v982_v28 = vadd.f32 %v2153_v27, %v981_v26 }
 0x117   : > { %v1000_v30 = vmax.f32 %v982_v28, 0.0 }
 0x11c   : > { %v983_v29 = vpop.f32.mrf.mxu3 }
 0x11d   : > { %v984_v31 = vadd.f32 %v2153_v27, %v983_v29 }
 0x11f   : > { %v1001_v34 = vmax.f32 %v984_v31, 0.0 }
 0x121   : > { %v2159_v35 = vpack.c.bf16 %v1001_v34, %v1000_v30 }
 0x123   : > { %477 = vmatmul.bf16.gmra.mxu1 %v1722_v9  ;;  %1074 = vmatpush.bf16.xpose.msrb.mxu0 %v2159_v35 }
 0x12b   : > { %1075 = vmatpush.bf16.xpose.msrb.mxu0 %v2166_v43 }
 0x133   : > { %482 = vmatmul.bf16.gmra.mxu1 %v1723_v10  ;;  %1076 = vmatpush.bf16.xpose.msrb.mxu0 %v2171_v51 }
 0x13b   : > { %1077 = vmatpush.bf16.xpose.msrb.mxu0 %v2175_v57 }
 0x143   : > { %487 = vmatmul.bf16.gmra.mxu1 %v1724_v11  ;;  %1078 = vmatpush.bf16.xpose.msrb.mxu0 %v2181_v1 }
 0x153   : > { %492 = vmatmul.bf16.gmra.mxu1 %v1725_v14 }
 0x163   : > { %497 = vmatmul.bf16.gmra.mxu1 %v1726_v17 }
 0x173   : > { %502 = vmatmul.bf16.gmra.mxu1 %v1727_v21 }
 0x183   : > { %507 = vmatmul.bf16.gmra.mxu1 %v1728_v25 }
 0x190   : > { %v473_v39 = vpop.f32.mrf.mxu1 }
 0x193   : > { %1652 = vmatmul.msk.bf16.vlgmr.msrb.gmra.mxu1 %vm302_vm0, %v1729_v37 }
 0x198   : > { %v475_v49 = vpop.f32.mrf.mxu1 }
 0x199   : > { %v513_v50 = vpack.c.bf16 %v475_v49, %v473_v39  ;;  %v1738_v49 = vld [vmem:[%s2951_s3] sm:$0xff] }
 0x1a0   : > { %v478_v56 = vpop.f32.mrf.mxu1 }
 0x1a3   : > { %1653 = vmatmul.msk.bf16.gmra.mxu1 %vm302_vm0, %v1730_v55  ;;  %v1745_v55 = vld [vmem:[%s2951_s3 + $0x38] sm:$0xff] }
 0x1a8   : > { %v480_v63 = vpop.f32.mrf.mxu1 }
 0x1a9   : > { %v514_v0 = vpack.c.bf16 %v480_v63, %v478_v56 }
 0x1b0   : > { %v483_v3 = vpop.f32.mrf.mxu1 }
 0x1b3   : > { %1654 = vmatmul.msk.bf16.gmra.mxu1 %vm302_vm0, %v1731_v2 }
 0x1b8   : > { %v485_v5 = vpop.f32.mrf.mxu1 }
 0x1b9   : > { %v515_v6 = vpack.c.bf16 %v485_v5, %v483_v3 }
 0x1c0   : > { %v488_v8 = vpop.f32.mrf.mxu1 }
 0x1c8   : > { %v490_v9 = vpop.f32.mrf.mxu1 }
 0x1c9   : > { %v516_v10 = vpack.c.bf16 %v490_v9, %v488_v8 }
 0x1d0   : > { %v493_v11 = vpop.f32.mrf.mxu1 }
 0x1d8   : > { %v495_v12 = vpop.f32.mrf.mxu1 }
 0x1d9   : > { %v517_v25 = vpack.c.bf16 %v495_v12, %v493_v11 }
 0x1e0   : > { %v498_v13 = vpop.f32.mrf.mxu1 }
 0x1e8   : > { %v500_v14 = vpop.f32.mrf.mxu1 }
 0x1e9   : > { %v518_v24 = vpack.c.bf16 %v500_v14, %v498_v13 }
 0x1f0   : > { %v503_v15 = vpop.f32.mrf.mxu1 }
 0x1f8   : > { %v505_v16 = vpop.f32.mrf.mxu1 }
 0x1f9   : > { %v519_v21 = vpack.c.bf16 %v505_v16, %v503_v15 }
 0x200   : > { %v508_v17 = vpop.f32.mrf.mxu1 }
 0x208   : > { %v510_v19 = vpop.f32.mrf.mxu1 }
 0x209   : > { %v520_v20 = vpack.c.bf16 %v510_v19, %v508_v17 }
 0x20b   : > { %521 = vmatpush.bf16.msrb.mxu2 %v520_v20 }
 0x20f   : > { %522 = vmatpush.bf16.msrb.mxu2 %v519_v21  ;;  %v2262_v21 = vld [vmem:[%s2952_s4 + $0x28] sm:$0xff] }
 0x210   : > { %v946_v22 = vpop.f32.mrf.mxu1 }
 0x211   : > { %v947_v45 = vadd.f32 %v2153_v27, %v946_v22 }
 0x213   : > { %523 = vmatpush.bf16.msrb.mxu2 %v518_v24  ;;  %v986_v46 = vmax.f32 %v947_v45, 0.0  ;;  %v2269_v24 = vld [vmem:[%s2952_s4] sm:$0xff] }
 0x217   : > { %524 = vmatpush.bf16.msrb.mxu2 %v517_v25  ;;  %v2274_v25 = vld [vmem:[%s2952_s4 + $0x20] sm:$0xff] }
 0x218   : > { %v948_v26 = vpop.f32.mrf.mxu1 }
 0x219   : > { %v949_v42 = vadd.f32 %v2153_v27, %v948_v26  ;;  %v2279_v26 = vld [vmem:[%s2952_s4 + $0x30] sm:$0xff] }
 0x21b   : > { %525 = vmatpush.bf16.msrb.mxu2 %v516_v10 }
 0x21f   : > { %526 = vmatpush.bf16.msrb.mxu2 %v515_v6 }
 0x220   : > { %v951_v28 = vpop.f32.mrf.mxu1 }
 0x221   : > { %v952_v39 = vadd.f32 %v2153_v27, %v951_v28  ;;  %v2284_v28 = vld [vmem:[%s2952_s4 + $0x8] sm:$0xff] }
 0x223   : > { %527 = vmatpush.bf16.msrb.mxu2 %v514_v0 }
 0x227   : > { %528 = vmatpush.bf16.msrb.mxu2 %v513_v50  ;;  %v1741_v50 = vld [vmem:[%s2951_s3 + $0x18] sm:$0xff] }
 0x228   : > { %v953_v29 = vpop.f32.mrf.mxu1 }
 0x229   : > { %v954_v37 = vadd.f32 %v2153_v27, %v953_v29  ;;  %v2289_v29 = vld [vmem:[%s2952_s4 + $0x38] sm:$0xff] }
 0x22a   : > { %529 = vmatmul.bf16.vlgmr.msrb.gmra.mxu2 %v2076_v18  ;;  %v988_v18 = vmax.f32 %v952_v39, 0.0 }
 0x22b   : > { %v989_v40 = vmax.f32 %v954_v37, 0.0 }
 0x22d   : > { %v2196_v44 = vpack.c.bf16 %v989_v40, %v988_v18  ;;  %v2323_v40 = vld [vmem:[%s2952_s4 + $0x50] sm:$0xff]  ;;  %v2328_v18 = vld [vmem:[%s2952_s4 + $0x58] sm:$0xff] }
 0x22e   : > { %2964 = vst [vmem:[#allocation3_spill] sm:$0xff] %v2323_v40 }
 0x22f   : > { %2965 = vst [vmem:[#allocation4_spill] sm:$0xff] %v2328_v18 }
 0x230   : > { %v956_v30 = vpop.f32.mrf.mxu1 }
 0x231   : > { %v957_v31 = vadd.f32 %v2153_v27, %v956_v30  ;;  %v2294_v30 = vld [vmem:[%s2952_s4 + $0x48] sm:$0xff] }
 0x233   : > { %v990_v34 = vmax.f32 %v957_v31, 0.0 }
 0x238   : > { %v958_v32 = vpop.f32.mrf.mxu1 }
 0x239   : > { %v959_v33 = vadd.f32 %v2153_v27, %v958_v32  ;;  %v1739_v27 = vld [vmem:[%s2951_s3 + $0x8] sm:$0xff]  ;;  %v2299_v32 = vld [vmem:[%s2952_s4 + $0x10] sm:$0xff] }
 0x23a   : > { %534 = vmatmul.bf16.gmra.mxu2 %v2122_v7  ;;  %v987_v7 = vmax.f32 %v949_v42, 0.0  ;;  %v2333_v42 = vld [vmem:[%s2952_s4 + $0x68] sm:$0xff] }
 0x23b   : > { %v991_v36 = vmax.f32 %v959_v33, 0.0  ;;  %v2304_v33 = vld [vmem:[%s2952_s4 + $0x18] sm:$0xff]  ;;  %2966 = vst [vmem:[#allocation5_spill] sm:$0xff] %v2333_v42 }
 0x23c   : > { %v2201_v48 = vpack.c.bf16 %v987_v7, %v986_v46 }
 0x23d   : > { %v2191_v38 = vpack.c.bf16 %v991_v36, %v990_v34  ;;  %v2312_v36 = vld [vmem:[%s2952_s4 + $0x40] sm:$0xff] }
 0x23e   : > { %2963 = vst [vmem:[#allocation2_spill] sm:$0xff] %v2312_v36 }
 0x23f   : > { %1079 = vmatpush.bf16.xpose.msrb.mxu0 %v2191_v38 }
 0x247   : > { %1080 = vmatpush.bf16.xpose.msrb.mxu0 %v2196_v44 }
 0x24a   : > { %539 = vmatmul.bf16.gmra.mxu2 %v2118_v4  ;;  %v1740_v4 = vld [vmem:[%s2951_s3 + $0x10] sm:$0xff] }
 0x24f   : > { %1081 = vmatpush.bf16.xpose.msrb.mxu0 %v2201_v48 }
 0x256   : > { %1082 = vmatmul.bf16.vlgmr.msrb.gmra.mxu0 %v1738_v49 }
 0x25a   : > { %544 = vmatmul.bf16.gmra.mxu2 %v2112_v62  ;;  %v1742_v62 = vld [vmem:[%s2951_s3 + $0x20] sm:$0xff] }
 0x266   : > { %1087 = vmatmul.bf16.gmra.mxu0 %v1739_v27 }
 0x26a   : > { %549 = vmatmul.bf16.gmra.mxu2 %v2079_v23  ;;  %v1743_v23 = vld [vmem:[%s2951_s3 + $0x28] sm:$0xff] }
 0x276   : > { %1092 = vmatmul.bf16.gmra.mxu0 %v1740_v4 }
 0x27a   : > { %554 = vmatmul.bf16.gmra.mxu2 %v2102_v53 }
 0x286   : > { %1097 = vmatmul.bf16.gmra.mxu0 %v1741_v50 }
 0x28a   : > { %559 = vmatmul.bf16.gmra.mxu2 %v2096_v47 }
 0x296   : > { %1102 = vmatmul.bf16.gmra.mxu0 %v1742_v62  ;;  %v2359_v62 = vld [vmem:[%s2952_s4 + $0x60] sm:$0xff] }
 0x297   : > { %2967 = vst [vmem:[#allocation6_spill] sm:$0xff] %v2359_v62 }
 0x29a   : > { %564 = vmatmul.bf16.gmra.mxu2 %v2091_v41 }
 0x2a6   : > { %1107 = vmatmul.bf16.gmra.mxu0 %v1743_v23  ;;  %v2364_v23 = vld [vmem:[%s2952_s4 + $0x70] sm:$0xff] }
 0x2a7   : > { %2968 = vst [vmem:[#allocation7_spill] sm:$0xff] %v2364_v23 }
 0x2ad   : > { %v530_v53 = vpop.f32.mrf.mxu2 }
 0x2ae   : > { %v2345_v49 = vmul.f32 %v2269_v24, %v530_v53 }
 0x2b5   : > { %v532_v54 = vpop.f32.mrf.mxu2 }
 0x2b6   : > { %1112 = vmatmul.bf16.gmra.mxu0 %v1744_v52  ;;  %v2336_v45 = vmul.f32 %v2284_v28, %v532_v54 }
 0x2bd   : > { %v535_v47 = vpop.f32.mrf.mxu2 }
 0x2be   : > { %v2348_v27 = vmul.f32 %v2299_v32, %v535_v47 }
 0x2c5   : > { %v537_v56 = vpop.f32.mrf.mxu2 }
 0x2c6   : > { %1117 = vmatmul.bf16.gmra.mxu0 %v1745_v55  ;;  %v2351_v4 = vmul.f32 %v2304_v33, %v537_v56 }
 0x2cd   : > { %v540_v41 = vpop.f32.mrf.mxu2 }
 0x2ce   : > { %v2315_v37 = vmul.f32 %v2274_v25, %v540_v41 }
 0x2d0   : > { %v602_v55 = vmax.f32 %v2345_v49, %v2315_v37 }
 0x2d3   : > { %v2233_v58 = vpop.f32.mrf.mxu0 }
 0x2d5   : > { %v542_v59 = vpop.f32.mrf.mxu2 }
 0x2d6   : > { %v2307_v34 = vmul.f32 %v2262_v21, %v542_v59  ;;  %v2384_v59 = vld [vmem:[%s2952_s4 + $0x78] sm:$0xff] }
 0x2d7   : > { %2969 = vst [vmem:[#allocation8_spill] sm:$0xff] %v2384_v59 }
 0x2d8   : > { %v603_v53 = vmax.f32 %v2336_v45, %v2307_v34 }
 0x2db   : > { %v2235_v60 = vpop.f32.mrf.mxu0 }
 0x2dd   : > { %v545_v63 = vpop.f32.mrf.mxu2 }
 0x2de   : > { %v2318_v39 = vmul.f32 %v2279_v26, %v545_v63 }
 0x2e0   : > { %v604_v56 = vmax.f32 %v2348_v27, %v2318_v39 }
 0x2e3   : > { %v2239_v0 = vpop.f32.mrf.mxu0 }
 0x2e5   : > { %v547_v2 = vpop.f32.mrf.mxu2 }
 0x2e6   : > { %v2339_v7 = vmul.f32 %v2289_v29, %v547_v2 }
 0x2e8   : > { %v605_v63 = vmax.f32 %v2351_v4, %v2339_v7 }
 0x2eb   : > { %v2241_v3 = vpop.f32.mrf.mxu0 }
 0x2ed   : > { %v550_v6 = vpop.f32.mrf.mxu2 }
 0x2ee   : > { %v2354_v50 = vmul.f32 %v2312_v36, %v550_v6 }
 0x2f3   : > { %v2245_v8 = vpop.f32.mrf.mxu0 }
 0x2f5   : > { %v552_v9 = vpop.f32.mrf.mxu2 }
 0x2f6   : > { %v2342_v46 = vmul.f32 %v2294_v30, %v552_v9 }
 0x2f8   : > { %v607_v2 = vmax.f32 %v603_v53, %v2342_v46 }
 0x2fb   : > { %v2247_v10 = vpop.f32.mrf.mxu0 }
 0x2fd   : > { %v555_v12 = vpop.f32.mrf.mxu2 }
 0x2fe   : > { %v2369_v52 = vmul.f32 %v2323_v40, %v555_v12  ;;  %v606_v12 = vmax.f32 %v602_v55, %v2354_v50 }
 0x303   : > { %v2251_v13 = vpop.f32.mrf.mxu0 }
 0x305   : > { %v557_v14 = vpop.f32.mrf.mxu2 }
 0x306   : > { %v2372_v54 = vmul.f32 %v2328_v18, %v557_v14 }
 0x308   : > { %v609_v61 = vmax.f32 %v605_v63, %v2372_v54 }
 0x30b   : > { %v2253_v15 = vpop.f32.mrf.mxu0 }
 0x30d   : > { %v560_v17 = vpop.f32.mrf.mxu2 }
 0x30e   : > { %v2390_v6 = vmul.f32 %v2359_v62, %v560_v17 }
 0x310   : > { %v610_v53 = vmax.f32 %v606_v12, %v2390_v6 }
 0x313   : > { %v2257_v19 = vpop.f32.mrf.mxu0 }
 0x315   : > { %v562_v20 = vpop.f32.mrf.mxu2 }
 0x316   : > { %v2375_v47 = vmul.f32 %v2333_v42, %v562_v20  ;;  %v608_v20 = vmax.f32 %v604_v56, %v2369_v52 }
 0x318   : > { %v611_v5 = vmax.f32 %v607_v2, %v2375_v47 }
 0x31b   : > { %v2264_v22 = vpop.f32.mrf.mxu0 }
 0x31d   : > { %v565_v31 = vpop.f32.mrf.mxu2 }
 0x31e   : > { %v2393_v9 = vmul.f32 %v2364_v23, %v565_v31  ;;  %v614_v31 = vmax.f32 %v610_v53, %v611_v5 }
 0x320   : > { %v612_v17 = vmax.f32 %v608_v20, %v2393_v9 }
 0x323   : > { %v1108_v41 = vpop.f32.mrf.mxu0 }
 0x325   : > { %v567_v14 = vpop.f32.mrf.mxu2 }
 0x326   : > { %v2400_v11 = vmul.f32 %v2384_v59, %v567_v14 }
 0x328   : > { %v613_v16 = vmax.f32 %v609_v61, %v2400_v11 }
 0x32a   : > { %v615_v23 = vmax.f32 %v612_v17, %v613_v16  ;;  %v1127_v16 = vpack.c.bf16 %v2264_v22, %v2257_v19 }
 0x32b   : > { %v1110_v62 = vpop.f32.mrf.mxu0 }
 0x32c   : > { %v616_v55 = vmax.f32 %v614_v31, %v615_v23  ;;  %v1128_v5 = vpack.c.bf16 %v1110_v62, %v1108_v41 }
 0x32e   : > { %v617_v42 = vrot.slane %v616_v55, 4 }
 0x330   : > { %v618_v18 = vmax.f32 %v616_v55, %v617_v42  ;;  %v2972_v42 = vpack.c.bf16 %v2241_v3, %v2239_v0 }
 0x332   : > { %v619_v56 = vrot.slane %v618_v18, 2 }
 0x333   : > { %v1113_v40 = vpop.f32.mrf.mxu0 }
 0x334   : > { %v620_v63 = vmax.f32 %v618_v18, %v619_v56  ;;  %v2970_v18 = vpack.c.bf16 %v2253_v15, %v2251_v13 }
 0x336   : > { %v621_v36 = vrot.slane %v620_v63, 1 }
 0x338   : > { %v2405_v2 = vmax.f32 %v620_v63, %v621_v36  ;;  %v2971_v36 = vpack.c.bf16 %v2247_v10, %v2245_v8 }
 0x33a   : > { %671 = vmax.xlane.f32.xlu0 %v2405_v2  ;;  %v629_v22 = vsub.f32 %v2318_v39, %v2405_v2 }
 0x33b   : > { %v1115_v14 = vpop.f32.mrf.mxu0 }
 0x33c   : > { %v1129_v61 = vpack.c.bf16 %v1115_v14, %v1113_v40  ;;  %v2973_v40 = vpack.c.bf16 %v2235_v60, %v2233_v58  ;;  %v625_v58 = vsub.f32 %v2348_v27, %v2405_v2  ;;  %v651_v27 = vmul.f32 1.442695, %v629_v22 }
 0x33d   : > { %v634_v14 = vsub.f32 %v2372_v54, %v2405_v2 }
 0x343   : > { %v1118_v12 = vpop.f32.mrf.mxu0 }
 0x34b   : > { %v1120_v59 = vpop.f32.mrf.mxu0 }
 0x34c   : > { %v1130_v20 = vpack.c.bf16 %v1120_v59, %v1118_v12  ;;  %v631_v59 = vsub.f32 %v2354_v50, %v2405_v2  ;;  %v635_v50 = vsub.f32 %v2390_v6, %v2405_v2 }
 0x34e   : > { %1131 = vmatpush.bf16.msrb.mxu3 %v1130_v20  ;;  %v655_v31 = vmul.f32 1.442695, %v631_v59  ;;  %v663_v20 = vmul.f32 1.442695, %v635_v50  ;;  %v633_v50 = vsub.f32 %v2369_v52, %v2405_v2 }
 0x352   : > { %1132 = vmatpush.bf16.msrb.mxu3 %v1129_v61  ;;  %v661_v61 = vmul.f32 1.442695, %v634_v14 }
 0x356   : > { %1133 = vmatpush.bf16.msrb.mxu3 %v1128_v5 }
 0x35a   : > { %1134 = vmatpush.bf16.msrb.mxu3 %v1127_v16 }
 0x35e   : > { %1135 = vmatpush.bf16.msrb.mxu3 %v2970_v18  ;;  %v638_v18 = vsub.f32 %v2400_v11, %v2405_v2 }
 0x362   : > { %1136 = vmatpush.bf16.msrb.mxu3 %v2971_v36  ;;  %v637_v36 = vsub.f32 %v2393_v9, %v2405_v2 }
 0x364   : > { %v667_v11 = vmul.f32 1.442695, %v637_v36 }
 0x366   : > { %1137 = vmatpush.bf16.msrb.mxu3 %v2972_v42  ;;  %v669_v42 = vmul.f32 1.442695, %v638_v18 }
 0x36a   : > { %1138 = vmatpush.bf16.msrb.mxu3 %v2973_v40 }
 0x36d   : > { %1139 = vmatmul.bf16.vlgmr.msrb.gmra.mxu3 %v2201_v48  ;;  %v623_v48 = vsub.f32 %v2345_v49, %v2405_v2 }
 0x37d   : > { %1144 = vmatmul.bf16.gmra.mxu3 %v2196_v44 }
 0x38d   : > { %1149 = vmatmul.bf16.gmra.mxu3 %v2191_v38  ;;  %v643_v38 = vmul.f32 1.442695, %v625_v58 }
 0x38f   : > { %1857 = vpow2.f32 %v643_v38  ;;  %v627_v38 = vsub.f32 %v2315_v37, %v2405_v2 }
 0x395   : > { %v2439_v3 = vpop.eup %1857 }
 0x39d   : > { %1154 = vmatmul.bf16.gmra.mxu3 %v2181_v1  ;;  %v639_v1 = vmul.f32 1.442695, %v623_v48 }
 0x39f   : > { %1859 = vpow2.f32 %v639_v1 }
 0x3a5   : > { %v2441_v10 = vpop.eup %1859 }
 0x3ad   : > { %1159 = vmatmul.bf16.gmra.mxu3 %v2175_v57  ;;  %v672_v8 = vpop.xlane.xlu0 %671 }
 0x3ae   : > { %1843 = vpush %v672_v8 }
 0x3bd   : > { %1164 = vmatmul.bf16.gmra.mxu3 %v2171_v51  ;;  %v624_v51 = vsub.f32 %v2336_v45, %v2405_v2  ;;  %v628_v45 = vsub.f32 %v2307_v34, %v2405_v2  ;;  %v632_v34 = vsub.f32 %v2342_v46, %v2405_v2 }
 0x3bf   : > { %v657_v17 = vmul.f32 1.442695, %v632_v34 }
 0x3cd   : > { %1169 = vmatmul.bf16.gmra.mxu3 %v2166_v43  ;;  %v626_v43 = vsub.f32 %v2351_v4, %v2405_v2  ;;  %v649_v4 = vmul.f32 1.442695, %v628_v45  ;;  %v630_v45 = vsub.f32 %v2339_v7, %v2405_v2  ;;  %v659_v7 = vmul.f32 1.442695, %v633_v50 }
 0x3cf   : > { %v645_v0 = vmul.f32 1.442695, %v626_v43  ;;  %v647_v43 = vmul.f32 1.442695, %v627_v38  ;;  %v653_v34 = vmul.f32 1.442695, %v630_v45 }
 0x3dd   : > { %1174 = vmatmul.bf16.gmra.mxu3 %v2159_v35  ;;  %v641_v35 = vmul.f32 1.442695, %v624_v51 }
 0x3df   : > { %s1844_s6 = spop %1843 }
 0x3e0   : > { %v674_v44 = vstv %s1844_s6 }
 0x3e1   : > { %v675_v57 = vsub.f32 %v2405_v2, %v674_v44 }
 0x3e3   : > { %v676_v60 = vmul.f32 1.442695, %v675_v57 }
 0x3e5   : > { %1861 = vpow2.f32 %v676_v60 }
 0x3e6   : > { %1863 = vpow2.f32 %v645_v0 }
 0x3e7   : > { %1865 = vpow2.f32 %v641_v35 }
 0x3e8   : > { %1867 = vpow2.f32 %v651_v27 }
 0x3e9   : > { %1869 = vpow2.f32 %v649_v4 }
 0x3ea   : > { %1871 = vpow2.f32 %v657_v17 }
 0x3eb   : > { %v2443_v13 = vpop.eup %1861  ;;  %1873 = vpow2.f32 %v655_v31 }
 0x3ec   : > { %v2447_v15 = vmul.f32 %v2443_v13, %v2439_v3  ;;  %v2451_v19 = vmul.f32 %v2443_v13, %v2441_v10  ;;  %v2461_v62 = vpop.eup %1863  ;;  %1875 = vpow2.f32 %v663_v20 }
 0x3ed   : > { %v2463_v23 = vpop.eup %1865  ;;  %v2467_v41 = vmul.f32 %v2461_v62, %v2443_v13  ;;  %1877 = vpow2.f32 %v661_v61 }
 0x3ee   : > { %720 = vadd.xlane.f32.xlu2 %v2447_v15  ;;  %716 = vadd.xlane.f32.xlu1 %v2451_v19  ;;  %v2471_v39 = vmul.f32 %v2463_v23, %v2443_v13  ;;  %v2481_v55 = vpop.eup %1867  ;;  %1879 = vpow2.f32 %v669_v42  ;;  %v694_v60 = vadd.f32 %v2463_v23, %v2441_v10 }
 0x3ef   : > { %v2483_v56 = vpop.eup %1869  ;;  %v2487_v63 = vmul.f32 %v2481_v55, %v2443_v13  ;;  %1881 = vpow2.f32 %v667_v11  ;;  %v636_v11 = vsub.f32 %v2375_v47, %v2405_v2 }
 0x3f0   : > { %v2459_v49 = vpop.f32.mrf.mxu3  ;;  %v2491_v46 = vmul.f32 %v2483_v56, %v2443_v13  ;;  %v2501_v5 = vpop.eup %1871  ;;  %v695_v37 = vadd.f32 %v2439_v3, %v694_v60  ;;  %1883 = vpow2.f32 %v647_v43 }
 0x3f1   : > { %v2503_v16 = vpop.eup %1873  ;;  %v2509_v6 = vmul.f32 %v2501_v5, %v2443_v13  ;;  %1885 = vpow2.f32 %v653_v34  ;;  %v665_v52 = vmul.f32 1.442695, %v636_v11 }
 0x3f2   : > { %v2513_v54 = vmul.f32 %v2503_v16, %v2443_v13  ;;  %v2521_v8 = vpop.eup %1875  ;;  %v696_v22 = vadd.f32 %v2461_v62, %v695_v37  ;;  %1887 = vpow2.f32 %v659_v7 }
 0x3f3   : > { %v2523_v58 = vpop.eup %1877  ;;  %v2527_v48 = vmul.f32 %v2521_v8, %v2443_v13  ;;  %1889 = vpow2.f32 %v665_v52 }
 0x3f4   : > { %v2531_v9 = vmul.f32 %v2523_v58, %v2443_v13  ;;  %v2537_v1 = vpop.eup %1879 }
 0x3f5   : > { %v2539_v57 = vpop.eup %1881  ;;  %v2545_v51 = vmul.f32 %v2537_v1, %v2443_v13 }
 0x3f6   : > { %722 = vadd.xlane.f32.xlu2 %v2467_v41  ;;  %718 = vadd.xlane.f32.xlu1 %v2471_v39  ;;  %v2549_v0 = vmul.f32 %v2539_v57, %v2443_v13  ;;  %v2557_v27 = vpop.eup %1883 }
 0x3f7   : > { %v697_v4 = vadd.f32 %v2557_v27, %v696_v22  ;;  %v2564_v20 = vpop.eup %1885 }
 0x3f8   : > { %v2479_v53 = vpop.f32.mrf.mxu3  ;;  %v2571_v38 = vpop.eup %1887 }
 0x3f9   : > { %v698_v17 = vadd.f32 %v2483_v56, %v697_v4  ;;  %2974 = vst [vmem:[#allocation9_spill] sm:$0xff] %v2571_v38  ;;  %v2576_v4 = vpop.eup %1889 }
 0x3fb   : > { %v699_v31 = vadd.f32 %v2481_v55, %v698_v17 }
 0x3fd   : > { %v700_v61 = vadd.f32 %v2564_v20, %v699_v31 }
 0x3fe   : > { %728 = vadd.xlane.f32.xlu2 %v2487_v63  ;;  %726 = vadd.xlane.f32.xlu1 %v2491_v46 }
 0x3ff   : > { %v701_v18 = vadd.f32 %v2503_v16, %v700_v61 }
 0x400   : > { %v2499_v12 = vpop.f32.mrf.mxu3 }
 0x401   : > { %v702_v42 = vadd.f32 %v2501_v5, %v701_v18 }
 0x403   : > { %v703_v60 = vadd.f32 %v2571_v38, %v702_v42 }
 0x405   : > { %v704_v37 = vadd.f32 %v2523_v58, %v703_v60 }
 0x406   : > { %734 = vadd.xlane.f32.xlu2 %v2509_v6  ;;  %732 = vadd.xlane.f32.xlu1 %v2513_v54 }
 0x407   : > { %v705_v22 = vadd.f32 %v2521_v8, %v704_v37 }
 0x408   : > { %v2519_v40 = vpop.f32.mrf.mxu3 }
 0x409   : > { %v706_v34 = vadd.f32 %v2576_v4, %v705_v22 }
 0x40b   : > { %v707_v17 = vadd.f32 %v2539_v57, %v706_v34 }
 0x40d   : > { %v708_v47 = vadd.f32 %v2537_v1, %v707_v17 }
 0x40e   : > { %740 = vadd.xlane.f32.xlu2 %v2527_v48  ;;  %738 = vadd.xlane.f32.xlu1 %v2531_v9 }
 0x40f   : > { %v709_v2 = vrot.slane %v708_v47, 4 }
 0x410   : > { %v1150_v44 = vpop.f32.mrf.mxu3 }
 0x411   : > { %v710_v61 = vadd.f32 %v709_v2, %v708_v47  ;;  %v2585_v22 = vmul.f32 %v1150_v44, %v2274_v25  ;;  %v2595_v47 = vmul.f32 %v2479_v53, %v2284_v28  ;;  %v2606_v25 = vmul.f32 %v2499_v12, %v2299_v32 }
 0x413   : > { %v711_v7 = vrot.slane %v710_v61, 2 }
 0x415   : > { %v712_v42 = vadd.f32 %v711_v7, %v710_v61 }
 0x416   : > { %746 = vadd.xlane.f32.xlu2 %v2545_v51  ;;  %744 = vadd.xlane.f32.xlu1 %v2549_v0 }
 0x417   : > { %v713_v11 = vrot.slane %v712_v42, 1 }
 0x418   : > { %v1152_v35 = vpop.f32.mrf.mxu3 }
 0x419   : > { %v2582_v52 = vmul.f32 %v1152_v35, %v2262_v21  ;;  %v714_v2 = vadd.f32 %v713_v11, %v712_v42  ;;  %v2602_v21 = vmul.f32 %v2459_v49, %v2269_v24  ;;  %v2977_v35 = vld [vmem:[#allocation4_spill] sm:$0xff]  ;;  %v2978_v49 = vld [vmem:[#allocation5_spill] sm:$0xff] }
 0x41b   : > { %v1213_v28 = vmax.f32 %v2595_v47, %v2582_v52  ;;  %v1212_v32 = vmax.f32 %v2602_v21, %v2585_v22 }
 0x420   : > { %v1155_v59 = vpop.f32.mrf.mxu3 }
 0x421   : > { %v2588_v34 = vmul.f32 %v1155_v59, %v2279_v26  ;;  %v2610_v26 = vmul.f32 %v2519_v40, %v2304_v33 }
 0x423   : > { %v1214_v33 = vmax.f32 %v2606_v25, %v2588_v34 }
 0x428   : > { %v1157_v14 = vpop.f32.mrf.mxu3 }
 0x429   : > { %v2591_v17 = vmul.f32 %v1157_v14, %v2289_v29  ;;  %v2975_v29 = vld [vmem:[#allocation2_spill] sm:$0xff] }
 0x42a   : > { %v2979_v14 = vld [vmem:[#allocation6_spill] sm:$0xff] }
 0x42b   : > { %v1215_v12 = vmax.f32 %v2610_v26, %v2591_v17 }
 0x430   : > { %v1160_v36 = vpop.f32.mrf.mxu3 }
 0x431   : > { %v2613_v44 = vmul.f32 %v1160_v36, %v2975_v29 }
 0x438   : > { %v1162_v43 = vpop.f32.mrf.mxu3 }
 0x439   : > { %v2598_v61 = vmul.f32 %v1162_v43, %v2294_v30  ;;  %v2976_v30 = vld [vmem:[#allocation3_spill] sm:$0xff] }
 0x43a   : > { %v2980_v43 = vld [vmem:[#allocation7_spill] sm:$0xff] }
 0x43b   : > { %v1217_v40 = vmax.f32 %v1213_v28, %v2598_v61 }
 0x440   : > { %v1165_v45 = vpop.f32.mrf.mxu3 }
 0x441   : > { %v2618_v53 = vmul.f32 %v1165_v45, %v2976_v30 }
 0x448   : > { %v1167_v31 = vpop.f32.mrf.mxu3 }
 0x449   : > { %v2621_v24 = vmul.f32 %v1167_v31, %v2977_v35  ;;  %v1216_v31 = vmax.f32 %v1212_v32, %v2613_v44 }
 0x44b   : > { %v1219_v42 = vmax.f32 %v1215_v12, %v2621_v24 }
 0x450   : > { %v1170_v50 = vpop.f32.mrf.mxu3 }
 0x451   : > { %v2634_v36 = vmul.f32 %v1170_v50, %v2979_v14 }
 0x458   : > { %v1172_v18 = vpop.f32.mrf.mxu3 }
 0x459   : > { %v2624_v59 = vmul.f32 %v1172_v18, %v2978_v49  ;;  %v1218_v18 = vmax.f32 %v1214_v33, %v2618_v53 }
 0x45b   : > { %v1221_v11 = vmax.f32 %v1217_v40, %v2624_v59 }
 0x460   : > { %v1175_v60 = vpop.f32.mrf.mxu3 }
 0x461   : > { %v721_v37 = vpop.xlane.xlu2 %720  ;;  %v717_v38 = vpop.xlane.xlu1 %716  ;;  %v2637_v45 = vmul.f32 %v1175_v60, %v2980_v43  ;;  %v1220_v60 = vmax.f32 %v1216_v31, %v2634_v36 }
 0x462   : > { %1891 = vrcp.f32 %v721_v37  ;;  %v2981_v37 = vld [vmem:[#allocation8_spill] sm:$0xff] }
 0x463   : > { %1893 = vrcp.f32 %v717_v38  ;;  %v1222_v38 = vmax.f32 %v1218_v18, %v2637_v45  ;;  %v1224_v49 = vmax.f32 %v1220_v60, %v1221_v11 }
 0x464   : > { %1895 = vrcp.f32 %v714_v2 }
 0x468   : > { %v1177_v7 = vpop.f32.mrf.mxu3  ;;  %v1892_v30 = vpop.eup %1891 }
 0x469   : > { %v2644_v29 = vmul.f32 %v1177_v7, %v2981_v37  ;;  %v723_v28 = vpop.xlane.xlu2 %722  ;;  %v719_v50 = vpop.xlane.xlu1 %718  ;;  %v782_v12 = vmul.f32 %v1892_v30, %v2447_v15 }
 0x46a   : > { %1897 = vrcp.f32 %v723_v28  ;;  %v1894_v35 = vpop.eup %1893 }
 0x46b   : > { %v1223_v2 = vmax.f32 %v1219_v42, %v2644_v29  ;;  %1899 = vrcp.f32 %v719_v50  ;;  %v2649_v33 = vpop.eup %1895  ;;  %v780_v43 = vmul.f32 %v1894_v35, %v2451_v19 }
 0x46c   : > { %v766_v31 = vmul.f32 %v2649_v33, %v2439_v3  ;;  %v767_v42 = vmul.f32 %v2649_v33, %v2461_v62  ;;  %v764_v15 = vmul.f32 %v2649_v33, %v2441_v10  ;;  %v765_v50 = vmul.f32 %v2649_v33, %v2463_v23 }
 0x46d   : > { %v1225_v32 = vmax.f32 %v1222_v38, %v1223_v2 }
 0x46e   : > { %v798_v60 = vmul.f32 %v782_v12, %v766_v31  ;;  %v796_v2 = vmul.f32 %v780_v43, %v764_v15  ;;  %v769_v43 = vmul.f32 %v2649_v33, %v2483_v56 }
 0x46f   : > { %v1226_v40 = vmax.f32 %v1224_v49, %v1225_v32  ;;  %v770_v32 = vmul.f32 %v2649_v33, %v2481_v55 }
 0x470   : > { %v1898_v14 = vpop.eup %1897 }
 0x471   : > { %v1900_v7 = vpop.eup %1899  ;;  %v1227_v18 = vrot.slane %v1226_v40, 4  ;;  %v783_v11 = vmul.f32 %v1898_v14, %v2467_v41  ;;  %v729_v37 = vpop.xlane.xlu2 %728 }
 0x472   : > { %v727_v28 = vpop.xlane.xlu1 %726  ;;  %v781_v19 = vmul.f32 %v1900_v7, %v2471_v39  ;;  %1901 = vrcp.f32 %v729_v37 }
 0x473   : > { %v1228_v38 = vmax.f32 %v1226_v40, %v1227_v18  ;;  %v799_v3 = vmul.f32 %v783_v11, %v767_v42  ;;  %1903 = vrcp.f32 %v727_v28 }
 0x474   : > { %v797_v10 = vmul.f32 %v781_v19, %v765_v50  ;;  %v682_v19 = vmul.f32 %v2557_v27, %v2443_v13 }
 0x475   : > { %v1229_v62 = vrot.slane %v1228_v38, 2  ;;  %v1754_v41 = vpack.c.bf16 %v799_v3, %v798_v60 }
 0x476   : > { %v1749_v23 = vpack.c.bf16 %v797_v10, %v796_v2 }
 0x477   : > { %v1230_v30 = vmax.f32 %v1228_v38, %v1229_v62  ;;  %1826 = vst [vmem:[%s2668_s9 + $0x8] sm:$0xff] %v1754_v41  }
 0x478   : > { %v1902_v39 = vpop.eup %1901  ;;  %1750 = vst [vmem:[%s2668_s9] sm:$0xff] %v1749_v23   ;;  %v685_v23 = vmul.f32 %v2564_v20, %v2443_v13 }
 0x479   : > { %v1904_v35 = vpop.eup %1903  ;;  %v1231_v49 = vrot.slane %v1230_v30, 1  ;;  %v786_v12 = vmul.f32 %v1902_v39, %v2487_v63  ;;  %v735_v40 = vpop.xlane.xlu2 %734  ;;  %v773_v63 = vmul.f32 %v2649_v33, %v2501_v5 }
 0x47a   : > { %v733_v14 = vpop.xlane.xlu1 %732  ;;  %v785_v7 = vmul.f32 %v1904_v35, %v2491_v46  ;;  %1905 = vrcp.f32 %v735_v40  ;;  %v772_v46 = vmul.f32 %v2649_v33, %v2503_v16 }
 0x47b   : > { %v2678_v31 = vmax.f32 %v1230_v30, %v1231_v49  ;;  %v2680_v18 = vmul.f32 %v786_v12, %v770_v32  ;;  %1907 = vrcp.f32 %v733_v14  ;;  %v2982_v32 = vld [vmem:[#allocation9_spill] sm:$0xff] }
 0x47c   : > { %v801_v42 = vmul.f32 %v785_v7, %v769_v43  ;;  %v688_v12 = vmul.f32 %v2982_v32, %v2443_v13  ;;  %v691_v43 = vmul.f32 %v2576_v4, %v2443_v13  ;;  %v771_v13 = vmul.f32 %v2649_v33, %v2564_v20 }
 0x47d   : > { %1281 = vmax.xlane.f32.xlu0 %v2678_v31  ;;  %v777_v20 = vmul.f32 %v2649_v33, %v2576_v4 }
 0x480   : > { %v1906_v11 = vpop.eup %1905 }
 0x481   : > { %v1908_v55 = vpop.eup %1907  ;;  %v789_v37 = vmul.f32 %v1906_v11, %v2509_v6  ;;  %v741_v56 = vpop.xlane.xlu2 %740  ;;  %v776_v6 = vmul.f32 %v2649_v33, %v2521_v8 }
 0x482   : > { %v739_v28 = vpop.xlane.xlu1 %738  ;;  %v788_v15 = vmul.f32 %v1908_v55, %v2513_v54  ;;  %1909 = vrcp.f32 %v741_v56  ;;  %v775_v54 = vmul.f32 %v2649_v33, %v2523_v58  ;;  %v778_v58 = vmul.f32 %v2649_v33, %v2539_v57 }
 0x483   : > { %v805_v50 = vmul.f32 %v789_v37, %v773_v63  ;;  %1911 = vrcp.f32 %v739_v28 }
 0x484   : > { %v804_v60 = vmul.f32 %v788_v15, %v772_v46 }
 0x485   : > { %724 = vadd.xlane.f32.xlu0 %v682_v19 }
 0x486   : > { %v1769_v38 = vpack.c.bf16 %v805_v50, %v804_v60  ;;  %v774_v50 = vmul.f32 %v2649_v33, %v2982_v32  ;;  %v1241_v32 = vsub.f32 %v2613_v44, %v2678_v31 }
 0x488   : > { %v1910_v3 = vpop.eup %1909  ;;  %1829 = vst [vmem:[%s2668_s9 + $0x20] sm:$0xff] %v1769_v38  }
 0x489   : > { %v1912_v5 = vpop.eup %1911  ;;  %v792_v2 = vmul.f32 %v1910_v3, %v2527_v48  ;;  %v747_v16 = vpop.xlane.xlu2 %746  ;;  %v779_v48 = vmul.f32 %v2649_v33, %v2537_v1 }
 0x48a   : > { %v745_v10 = vpop.xlane.xlu1 %744  ;;  %v791_v62 = vmul.f32 %v1912_v5, %v2531_v9  ;;  %1913 = vrcp.f32 %v747_v16  ;;  %v1235_v16 = vsub.f32 %v2606_v25, %v2678_v31  ;;  %v1238_v25 = vsub.f32 %v2582_v52, %v2678_v31 }
 0x48b   : > { %v808_v41 = vmul.f32 %v792_v2, %v776_v6  ;;  %1915 = vrcp.f32 %v745_v10  ;;  %v1234_v10 = vsub.f32 %v2595_v47, %v2678_v31  ;;  %v1237_v47 = vsub.f32 %v2585_v22, %v2678_v31 }
 0x48c   : > { %v807_v30 = vmul.f32 %v791_v62, %v775_v54  ;;  %v1253_v62 = vmul.f32 1.442695, %v1235_v16 }
 0x48d   : > { %730 = vadd.xlane.f32.xlu0 %v685_v23 }
 0x490   : > { %v1914_v39 = vpop.eup %1913 }
 0x491   : > { %v1916_v8 = vpop.eup %1915  ;;  %v795_v35 = vmul.f32 %v1914_v39, %v2545_v51 }
 0x492   : > { %v794_v9 = vmul.f32 %v1916_v8, %v2549_v0  ;;  %v768_v0 = vmul.f32 %v2649_v33, %v2557_v27 }
 0x493   : > { %v811_v49 = vmul.f32 %v795_v35, %v779_v48  ;;  %v1259_v48 = vmul.f32 1.442695, %v1238_v25 }
 0x494   : > { %v810_v40 = vmul.f32 %v794_v9, %v778_v58  ;;  %v1257_v58 = vmul.f32 1.442695, %v1237_v47 }
 0x495   : > { %736 = vadd.xlane.f32.xlu0 %v688_v12 }
 0x496   : > { %v1784_v14 = vpack.c.bf16 %v811_v49, %v810_v40  ;;  %v1265_v40 = vmul.f32 1.442695, %v1241_v32 }
 0x498   : > { %1832 = vst [vmem:[%s2668_s9 + $0x38] sm:$0xff] %v1784_v14  }
 0x49d   : > { %742 = vadd.xlane.f32.xlu0 %v691_v43 }
 0x4f0   : > { %v1282_v1 = vpop.xlane.xlu0 %1281 }
 0x4f1   : > { %1845 = vpush %v1282_v1 }
 0x4f8   : > { %v725_v51 = vpop.xlane.xlu0 %724 }
 0x4f9   : > { %1917 = vrcp.f32 %v725_v51 }
 0x4ff   : > { %v1918_v57 = vpop.eup %1917 }
 0x500   : > { %v784_v7 = vmul.f32 %v1918_v57, %v682_v19  ;;  %v731_v11 = vpop.xlane.xlu0 %730 }
 0x501   : > { %1919 = vrcp.f32 %v731_v11  ;;  %v1243_v11 = vsub.f32 %v2618_v53, %v2678_v31  ;;  %v1245_v53 = vsub.f32 %v2634_v36, %v2678_v31 }
 0x502   : > { %v800_v55 = vmul.f32 %v784_v7, %v768_v0  ;;  %v1244_v7 = vsub.f32 %v2621_v24, %v2678_v31 }
 0x504   : > { %v1759_v63 = vpack.c.bf16 %v801_v42, %v800_v55 }
 0x506   : > { %1827 = vst [vmem:[%s2668_s9 + $0x10] sm:$0xff] %v1759_v63  }
 0x507   : > { %v1920_v37 = vpop.eup %1919 }
 0x508   : > { %v787_v56 = vmul.f32 %v1920_v37, %v685_v23  ;;  %v737_v28 = vpop.xlane.xlu0 %736  ;;  %v1269_v37 = vmul.f32 1.442695, %v1243_v11 }
 0x509   : > { %1921 = vrcp.f32 %v737_v28 }
 0x50a   : > { %v803_v46 = vmul.f32 %v787_v56, %v771_v13 }
 0x50c   : > { %v1764_v15 = vpack.c.bf16 %v803_v46, %v2680_v18  ;;  %v1233_v18 = vsub.f32 %v2602_v21, %v2678_v31  ;;  %v1236_v21 = vsub.f32 %v2610_v26, %v2678_v31  ;;  %v1239_v26 = vsub.f32 %v2588_v34, %v2678_v31 }
 0x50d   : > { %v1240_v34 = vsub.f32 %v2591_v17, %v2678_v31  ;;  %v1242_v17 = vsub.f32 %v2598_v61, %v2678_v31  ;;  %v1271_v61 = vmul.f32 1.442695, %v1244_v7 }
 0x50e   : > { %1828 = vst [vmem:[%s2668_s9 + $0x18] sm:$0xff] %v1764_v15   ;;  %v1249_v54 = vmul.f32 1.442695, %v1233_v18  ;;  %v1255_v39 = vmul.f32 1.442695, %v1236_v21  ;;  %v1247_v15 = vsub.f32 %v2637_v45, %v2678_v31 }
 0x50f   : > { %v1922_v27 = vpop.eup %1921  ;;  %v1267_v55 = vmul.f32 1.442695, %v1242_v17 }
 0x510   : > { %v790_v19 = vmul.f32 %v1922_v27, %v688_v12  ;;  %v743_v42 = vpop.xlane.xlu0 %742  ;;  %v1261_v12 = vmul.f32 1.442695, %v1239_v26  ;;  %v1246_v27 = vsub.f32 %v2624_v59, %v2678_v31  ;;  %v1277_v36 = vmul.f32 1.442695, %v1247_v15 }
 0x511   : > { %1923 = vrcp.f32 %v743_v42  ;;  %v1248_v59 = vsub.f32 %v2644_v29, %v2678_v31 }
 0x512   : > { %v806_v60 = vmul.f32 %v790_v19, %v774_v50  ;;  %1925 = vpow2.f32 %v1249_v54  ;;  %v1273_v50 = vmul.f32 1.442695, %v1245_v53  ;;  %v1275_v42 = vmul.f32 1.442695, %v1246_v27 }
 0x513   : > { %1927 = vpow2.f32 %v1253_v62 }
 0x514   : > { %v1774_v38 = vpack.c.bf16 %v807_v30, %v806_v60  ;;  %v1251_v30 = vmul.f32 1.442695, %v1234_v10 }
 0x516   : > { %1830 = vst [vmem:[%s2668_s9 + $0x28] sm:$0xff] %v1774_v38   ;;  %1929 = vpow2.f32 %v1251_v30 }
 0x517   : > { %v1924_v3 = vpop.eup %1923 }
 0x518   : > { %v793_v5 = vmul.f32 %v1924_v3, %v691_v43  ;;  %v1263_v43 = vmul.f32 1.442695, %v1240_v34 }
 0x51a   : > { %v809_v6 = vmul.f32 %v793_v5, %v777_v20  ;;  %v1279_v5 = vmul.f32 1.442695, %v1248_v59 }
 0x51c   : > { %v1779_v2 = vpack.c.bf16 %v809_v6, %v808_v41  ;;  %v2737_v41 = vpop.eup %1925 }
 0x51d   : > { %v2739_v8 = vpop.eup %1927 }
 0x51e   : > { %1831 = vst [vmem:[%s2668_s9 + $0x30] sm:$0xff] %v1779_v2   ;;  %v2741_v35 = vpop.eup %1929 }
 0x51f   : > { %v1304_v29 = vadd.f32 %v2741_v35, %v2737_v41 }
 0x521   : > { %v1305_v54 = vadd.f32 %v2739_v8, %v1304_v29 }
 0x522   : > { %s1846_s22 = spop %1845 }
 0x523   : > { %v1284_v23 = vstv %s1846_s22 }
 0x524   : > { %v1285_v4 = vsub.f32 %v2678_v31, %v1284_v23 }
 0x526   : > { %v1286_v33 = vmul.f32 1.442695, %v1285_v4 }
 0x528   : > { %1931 = vpow2.f32 %v1286_v33 }
 0x529   : > { %1933 = vpow2.f32 %v1255_v39 }
 0x52a   : > { %1935 = vpow2.f32 %v1259_v48 }
 0x52b   : > { %1937 = vpow2.f32 %v1257_v58 }
 0x52c   : > { %1939 = vpow2.f32 %v1261_v12 }
 0x52d   : > { %1941 = vpow2.f32 %v1265_v40 }
 0x52e   : > { %v2743_v9 = vpop.eup %1931  ;;  %1943 = vpow2.f32 %v1263_v43 }
 0x52f   : > { %v2749_v52 = vmul.f32 %v2743_v9, %v2737_v41  ;;  %v2753_v22 = vmul.f32 %v2743_v9, %v2739_v8  ;;  %v2757_v49 = vmul.f32 %v2743_v9, %v2741_v35  ;;  %v2766_v14 = vpop.eup %1933  ;;  %1945 = vpow2.f32 %v1267_v55 }
 0x530   : > { %v2768_v1 = vpop.eup %1935  ;;  %v2774_v44 = vmul.f32 %v2766_v14, %v2743_v9  ;;  %1947 = vpow2.f32 %v1271_v61  ;;  %v1306_v23 = vadd.f32 %v2766_v14, %v1305_v54 }
 0x531   : > { %1326 = vadd.xlane.f32.xlu0 %v2749_v52  ;;  %1330 = vadd.xlane.f32.xlu2 %v2753_v22  ;;  %v2770_v51 = vpop.eup %1937  ;;  %v2778_v57 = vmul.f32 %v2768_v1, %v2743_v9  ;;  %1949 = vpow2.f32 %v1269_v37 }
 0x532   : > { %1328 = vadd.xlane.f32.xlu1 %v2757_v49  ;;  %v2784_v0 = vmul.f32 %v2770_v51, %v2743_v9  ;;  %v2793_v63 = vpop.eup %1939  ;;  %1951 = vpow2.f32 %v1273_v50  ;;  %v1307_v4 = vadd.f32 %v2770_v51, %v1306_v23 }
 0x533   : > { %v2795_v13 = vpop.eup %1941  ;;  %v2801_v24 = vmul.f32 %v2793_v63, %v2743_v9  ;;  %1953 = vpow2.f32 %v1277_v36 }
 0x534   : > { %v2797_v56 = vpop.eup %1943  ;;  %v2805_v28 = vmul.f32 %v2795_v13, %v2743_v9  ;;  %1955 = vpow2.f32 %v1275_v42  ;;  %v1308_v33 = vadd.f32 %v2768_v1, %v1307_v4 }
 0x535   : > { %v2811_v46 = vmul.f32 %v2797_v56, %v2743_v9  ;;  %v2820_v19 = vpop.eup %1945  ;;  %1957 = vpow2.f32 %v1279_v5 }
 0x536   : > { %v2822_v60 = vpop.eup %1947  ;;  %v2828_v45 = vmul.f32 %v2820_v19, %v2743_v9  ;;  %v1309_v21 = vadd.f32 %v2793_v63, %v1308_v33 }
 0x537   : > { %v2824_v38 = vpop.eup %1949  ;;  %v2832_v3 = vmul.f32 %v2822_v60, %v2743_v9 }
 0x538   : > { %v2838_v20 = vmul.f32 %v2824_v38, %v2743_v9  ;;  %v2843_v6 = vpop.eup %1951  ;;  %v1310_v25 = vadd.f32 %v2797_v56, %v1309_v21 }
 0x539   : > { %1332 = vadd.xlane.f32.xlu0 %v2774_v44  ;;  %1336 = vadd.xlane.f32.xlu2 %v2778_v57  ;;  %v2845_v2 = vpop.eup %1953  ;;  %v2853_v31 = vmul.f32 %v2843_v6, %v2743_v9 }
 0x53a   : > { %1334 = vadd.xlane.f32.xlu1 %v2784_v0  ;;  %v2847_v18 = vpop.eup %1955  ;;  %v2857_v16 = vmul.f32 %v2845_v2, %v2743_v9  ;;  %v1311_v47 = vadd.f32 %v2795_v13, %v1310_v25 }
 0x53b   : > { %v2861_v10 = vmul.f32 %v2847_v18, %v2743_v9  ;;  %v2867_v62 = vpop.eup %1957 }
 0x53c   : > { %v2872_v30 = vmul.f32 %v2867_v62, %v2743_v9  ;;  %v1312_v39 = vadd.f32 %v2820_v19, %v1311_v47 }
 0x53e   : > { %v1313_v48 = vadd.f32 %v2824_v38, %v1312_v39 }
 0x540   : > { %v1314_v58 = vadd.f32 %v2822_v60, %v1313_v48 }
 0x541   : > { %1338 = vadd.xlane.f32.xlu0 %v2801_v24  ;;  %1342 = vadd.xlane.f32.xlu2 %v2805_v28 }
 0x542   : > { %1340 = vadd.xlane.f32.xlu1 %v2811_v46  ;;  %v1315_v9 = vadd.f32 %v2843_v6, %v1314_v58 }
 0x544   : > { %v1316_v26 = vadd.f32 %v2847_v18, %v1315_v9 }
 0x546   : > { %v1317_v32 = vadd.f32 %v2845_v2, %v1316_v26 }
 0x548   : > { %v1318_v34 = vadd.f32 %v2867_v62, %v1317_v32 }
 0x549   : > { %1344 = vadd.xlane.f32.xlu0 %v2828_v45  ;;  %1348 = vadd.xlane.f32.xlu2 %v2832_v3 }
 0x54a   : > { %1346 = vadd.xlane.f32.xlu1 %v2838_v20  ;;  %v1319_v12 = vrot.slane %v1318_v34, 4 }
 0x54c   : > { %v1320_v40 = vadd.f32 %v1319_v12, %v1318_v34 }
 0x54e   : > { %v1321_v43 = vrot.slane %v1320_v40, 2 }
 0x550   : > { %v1322_v17 = vadd.f32 %v1321_v43, %v1320_v40 }
 0x551   : > { %1350 = vadd.xlane.f32.xlu0 %v2853_v31  ;;  %1354 = vadd.xlane.f32.xlu2 %v2857_v16 }
 0x552   : > { %1352 = vadd.xlane.f32.xlu1 %v2861_v10  ;;  %v1323_v7 = vrot.slane %v1322_v17, 1 }
 0x554   : > { %v1324_v11 = vadd.f32 %v1323_v7, %v1322_v17 }
 0x556   : > { %1959 = vrcp.f32 %v1324_v11 }
 0x559   : > { %1356 = vadd.xlane.f32.xlu0 %v2872_v30 }
 0x55c   : > { %v2887_v53 = vpop.eup %1959 }
 0x55d   : > { %v1374_v27 = vmul.f32 %v2887_v53, %v2737_v41  ;;  %v1375_v54 = vmul.f32 %v2887_v53, %v2741_v35  ;;  %v1376_v47 = vmul.f32 %v2887_v53, %v2739_v8  ;;  %v1377_v39 = vmul.f32 %v2887_v53, %v2766_v14 }
 0x55e   : > { %v1379_v9 = vmul.f32 %v2887_v53, %v2768_v1  ;;  %v1378_v34 = vmul.f32 %v2887_v53, %v2770_v51 }
 0x5a4   : > { %v1327_v55 = vpop.xlane.xlu0 %1326  ;;  %v1331_v61 = vpop.xlane.xlu2 %1330 }
 0x5a5   : > { %1961 = vrcp.f32 %v1327_v55  ;;  %v1329_v37 = vpop.xlane.xlu1 %1328 }
 0x5a6   : > { %1963 = vrcp.f32 %v1329_v37 }
 0x5a7   : > { %1965 = vrcp.f32 %v1331_v61  ;;  %v1381_v61 = vmul.f32 %v2887_v53, %v2797_v56 }
 0x5ab   : > { %v1962_v15 = vpop.eup %1961 }
 0x5ac   : > { %v1390_v50 = vmul.f32 %v1962_v15, %v2749_v52  ;;  %v1333_v36 = vpop.xlane.xlu0 %1332  ;;  %v1337_v42 = vpop.xlane.xlu2 %1336 }
 0x5ad   : > { %v1964_v59 = vpop.eup %1963  ;;  %1967 = vrcp.f32 %v1333_v36  ;;  %v1335_v5 = vpop.xlane.xlu1 %1334 }
 0x5ae   : > { %v1406_v29 = vmul.f32 %v1390_v50, %v1374_v27  ;;  %v1391_v23 = vmul.f32 %v1964_v59, %v2757_v49  ;;  %1969 = vrcp.f32 %v1337_v42  ;;  %v1966_v4 = vpop.eup %1965  ;;  %v1382_v42 = vmul.f32 %v2887_v53, %v2795_v13 }
 0x5af   : > { %1971 = vrcp.f32 %v1335_v5  ;;  %v1392_v41 = vmul.f32 %v1966_v4, %v2753_v22  ;;  %v1383_v59 = vmul.f32 %v2887_v53, %v2820_v19  ;;  %v1384_v13 = vmul.f32 %v2887_v53, %v2824_v38 }
 0x5b0   : > { %v1407_v33 = vmul.f32 %v1391_v23, %v1375_v54 }
 0x5b1   : > { %v1408_v32 = vmul.f32 %v1392_v41, %v1376_v47 }
 0x5b2   : > { %v1789_v21 = vpack.c.bf16 %v1407_v33, %v1406_v29  ;;  %v1385_v29 = vmul.f32 %v2887_v53, %v2822_v60 }
 0x5b3   : > { %v1968_v52 = vpop.eup %1967 }
 0x5b4   : > { %v1970_v25 = vpop.eup %1969  ;;  %1833 = vst [vmem:[%s2668_s9 + $0x40] sm:$0xff] %v1789_v21   ;;  %v1393_v35 = vmul.f32 %v1968_v52, %v2774_v44  ;;  %v1339_v48 = vpop.xlane.xlu0 %1338 }
 0x5b5   : > { %v1343_v49 = vpop.xlane.xlu2 %1342  ;;  %v1972_v58 = vpop.eup %1971  ;;  %v1395_v22 = vmul.f32 %v1970_v25, %v2778_v57  ;;  %1973 = vrcp.f32 %v1339_v48  ;;  %v1380_v57 = vmul.f32 %v2887_v53, %v2793_v63 }
 0x5b6   : > { %v1341_v26 = vpop.xlane.xlu1 %1340  ;;  %v1409_v8 = vmul.f32 %v1393_v35, %v1377_v39  ;;  %v1394_v14 = vmul.f32 %v1972_v58, %v2784_v0  ;;  %v1387_v39 = vmul.f32 %v2887_v53, %v2847_v18 }
 0x5b7   : > { %v1411_v44 = vmul.f32 %v1395_v22, %v1379_v9  ;;  %1975 = vrcp.f32 %v1341_v26 }
 0x5b8   : > { %v1794_v12 = vpack.c.bf16 %v1409_v8, %v1408_v32  ;;  %v1410_v40 = vmul.f32 %v1394_v14, %v1378_v34  ;;  %1977 = vrcp.f32 %v1343_v49 }
 0x5ba   : > { %1834 = vst [vmem:[%s2668_s9 + $0x48] sm:$0xff] %v1794_v12   ;;  %v1799_v43 = vpack.c.bf16 %v1411_v44, %v1410_v40 }
 0x5bb   : > { %v1974_v1 = vpop.eup %1973 }
 0x5bc   : > { %1835 = vst [vmem:[%s2668_s9 + $0x50] sm:$0xff] %v1799_v43   ;;  %v1396_v17 = vmul.f32 %v1974_v1, %v2801_v24  ;;  %v1345_v7 = vpop.xlane.xlu0 %1344 }
 0x5bd   : > { %v1349_v11 = vpop.xlane.xlu2 %1348  ;;  %v1976_v51 = vpop.eup %1975  ;;  %1979 = vrcp.f32 %v1345_v7 }
 0x5be   : > { %v1347_v0 = vpop.xlane.xlu1 %1346  ;;  %v1412_v55 = vmul.f32 %v1396_v17, %v1380_v57  ;;  %v1397_v37 = vmul.f32 %v1976_v51, %v2811_v46  ;;  %1981 = vrcp.f32 %v1349_v11  ;;  %v1978_v15 = vpop.eup %1977 }
 0x5bf   : > { %1983 = vrcp.f32 %v1347_v0  ;;  %v1398_v63 = vmul.f32 %v1978_v15, %v2805_v28 }
 0x5c0   : > { %v1413_v27 = vmul.f32 %v1397_v37, %v1381_v61 }
 0x5c1   : > { %v1414_v23 = vmul.f32 %v1398_v63, %v1382_v42 }
 0x5c2   : > { %v1804_v50 = vpack.c.bf16 %v1413_v27, %v1412_v55 }
 0x5c3   : > { %v1980_v24 = vpop.eup %1979 }
 0x5c4   : > { %v1982_v36 = vpop.eup %1981  ;;  %1836 = vst [vmem:[%s2668_s9 + $0x58] sm:$0xff] %v1804_v50   ;;  %v1399_v56 = vmul.f32 %v1980_v24, %v2828_v45  ;;  %v1351_v5 = vpop.xlane.xlu0 %1350 }
 0x5c5   : > { %v1984_v46 = vpop.eup %1983  ;;  %v1401_v28 = vmul.f32 %v1982_v36, %v2832_v3  ;;  %1985 = vrcp.f32 %v1351_v5  ;;  %v1355_v33 = vpop.xlane.xlu2 %1354  ;;  %v1386_v3 = vmul.f32 %v2887_v53, %v2843_v6  ;;  %v1388_v6 = vmul.f32 %v2887_v53, %v2845_v2 }
 0x5c6   : > { %v1353_v54 = vpop.xlane.xlu1 %1352  ;;  %v1415_v4 = vmul.f32 %v1399_v56, %v1383_v59  ;;  %v1400_v19 = vmul.f32 %v1984_v46, %v2838_v20 }
 0x5c7   : > { %v1417_v45 = vmul.f32 %v1401_v28, %v1385_v29  ;;  %1987 = vrcp.f32 %v1353_v54 }
 0x5c8   : > { %v1809_v41 = vpack.c.bf16 %v1415_v4, %v1414_v23  ;;  %v1416_v21 = vmul.f32 %v1400_v19, %v1384_v13  ;;  %1989 = vrcp.f32 %v1355_v33 }
 0x5ca   : > { %1837 = vst [vmem:[%s2668_s9 + $0x60] sm:$0xff] %v1809_v41   ;;  %v1814_v60 = vpack.c.bf16 %v1417_v45, %v1416_v21 }
 0x5cb   : > { %v1986_v52 = vpop.eup %1985 }
 0x5cc   : > { %1838 = vst [vmem:[%s2668_s9 + $0x68] sm:$0xff] %v1814_v60   ;;  %v1402_v25 = vmul.f32 %v1986_v52, %v2853_v31  ;;  %v1357_v47 = vpop.xlane.xlu0 %1356  ;;  %v1389_v31 = vmul.f32 %v2887_v53, %v2867_v62 }
 0x5cd   : > { %v1988_v38 = vpop.eup %1987  ;;  %1991 = vrcp.f32 %v1357_v47 }
 0x5ce   : > { %v1418_v20 = vmul.f32 %v1402_v25, %v1386_v3  ;;  %v1403_v35 = vmul.f32 %v1988_v38, %v2861_v10  ;;  %v1990_v48 = vpop.eup %1989 }
 0x5cf   : > { %v1404_v58 = vmul.f32 %v1990_v48, %v2857_v16 }
 0x5d0   : > { %v1419_v49 = vmul.f32 %v1403_v35, %v1387_v39 }
 0x5d1   : > { %v1420_v32 = vmul.f32 %v1404_v58, %v1388_v6 }
 0x5d2   : > { %v1819_v9 = vpack.c.bf16 %v1419_v49, %v1418_v20 }
 0x5d3   : > { %v1992_v22 = vpop.eup %1991 }
 0x5d4   : > { %1839 = vst [vmem:[%s2668_s9 + $0x70] sm:$0xff] %v1819_v9   ;;  %v1405_v26 = vmul.f32 %v1992_v22, %v2872_v30 }
 0x5d6   : > { %v1421_v8 = vmul.f32 %v1405_v26, %v1389_v31 }
 0x5d8   : > { %v1824_v18 = vpack.c.bf16 %v1421_v8, %v1420_v32 }
 0x5da   : > { %1840 = vst [vmem:[%s2668_s9 + $0x78] sm:$0xff] %v1824_v18  }
 0x5db PF: > { %s15_s18 = sadd.s32 1, %s1999_s18  }
 0x5dc   : > { %p12_p4 = scmp.ge.s32.totalorder %s15_s18, 4  }
 0x5de   :  { %14 = sbr.rel (!%p12_p4) target bundleno = 1 (0x1), region = 72 }

</bundles_post_ra>
